<compile_context>
chip_gen: v6e
topology: v6e:2x2x1
jax: 0.10.0
libtpu: 0.0.40
codegen_flags: <defaults>
</compile_context>

<pallas_src>
import functools

import jax
import jax.numpy as jnp
from jax import lax
from jax.experimental import pallas as pl
from jax.experimental.pallas import tpu as pltpu


def _round_up(x, m):
    return (x + m - 1) // m * m


def _vmem_capacity_bytes():
    try:
        return int(pltpu.get_tpu_info().vmem_capacity_bytes)
    except Exception:
        return 64 * 1024 * 1024  # conservative (v7x-sized) fallback


def _vq_kernel(e_mm_ref, e_g_ref, e2_ref, x_ref, q_ref, sse_ref,
               run_min_ref, q_acc_ref, *, n_rem):
    """Grid = (token tiles ["parallel"], codebook chunks ["arbitrary"])."""
    i = pl.program_id(0)
    kb = pl.program_id(1)
    nkb = pl.num_programs(1)

    x = x_ref[...]                                     # (TN, D), latents dtype
    e_mm = e_mm_ref[...]                               # (TK, D), matmul dtype (bf16 default)
    tn = x.shape[0]
    tk = e_mm.shape[0]

    @pl.when(kb == 0)
    def _init():
        run_min_ref[...] = jnp.full(run_min_ref.shape, jnp.inf, run_min_ref.dtype)

    # Squared distance up to the token-only term: 0.5*||e_k||^2 - x.e_k
    # (||x||^2 dropped: argmin-invariant; 0.5*||e||^2 precomputed in the wrapper so the
    # old `- 2 * xe` multiply disappears.)
    xe = lax.dot_general(x.astype(e_mm.dtype), e_mm,
                         (((1,), (1,)), ((), ())),
                         preferred_element_type=jnp.float32)          # (TN, TK)
    dist = e2_ref[...] - xe                                           # (TN, TK)

    # First-occurrence argmin inside this chunk.  (The plain min is needed anyway for the
    # cross-chunk running minimum, so the min/where/min construction is effectively free
    # and avoids relying on an argmin primitive lowering.)
    local_min = jnp.min(dist, axis=-1, keepdims=True)                 # (TN, 1)
    iota_k = lax.broadcasted_iota(jnp.int32, (tn, tk), 1)
    local_idx = jnp.min(jnp.where(dist <= local_min, iota_k, tk),
                        axis=-1, keepdims=True)                       # (TN, 1)
    onehot = (iota_k == local_idx)

    # Gather this chunk's nearest rows in the codebook's NATIVE dtype (exact rows).
    e_g = e_g_ref[...]
    q_chunk = jnp.dot(onehot.astype(e_g.dtype), e_g,
                      preferred_element_type=jnp.float32)             # (TN, D)

    # Cross-chunk running (min, quantized) update; strict '<' keeps the earliest chunk on ties.
    better = local_min < run_min_ref[...]
    run_min_ref[...] = jnp.where(better, local_min, run_min_ref[...])
    q_acc_ref[...] = jnp.where(better, q_chunk, q_acc_ref[...])

    @pl.when(kb == nkb - 1)
    def _finalize():
        q = q_acc_ref[...]                                            # (TN, D) f32
        q_ref[...] = q.astype(q_ref.dtype)
        err = x.astype(jnp.float32) - q
        if n_rem:  # static: only the last token tile carries padded rows
            last = pl.num_programs(0) - 1

            @pl.when(i != last)
            def _():
                sse_ref[...] = jnp.sum(err * err).reshape(1, 1, 1)

            @pl.when(i == last)
            def _():
                row = lax.broadcasted_iota(jnp.int32, (tn, 1), 0)
                keep = (row < n_rem).astype(jnp.float32)
                errm = err * keep
                sse_ref[...] = jnp.sum(errm * errm).reshape(1, 1, 1)
        else:
            sse_ref[...] = jnp.sum(err * err).reshape(1, 1, 1)


@functools.partial(
    jax.jit,
    static_argnames=("commitment_cost", "tile_n", "tile_k",
                     "use_bf16_matmul", "single_buffer_resident"))
def vector_quantizer_forward(latents, embedding, commitment_cost=0.25,
                             tile_n=1024, tile_k=2048,
                             use_bf16_matmul=True, single_buffer_resident=True):
    """latents: (B, D, H, W) float (NCHW); embedding: (K, D) float.  Forward values only."""
    B, D, H, W = latents.shape
    K, Dk = embedding.shape
    assert D == Dk
    N = B * H * W

    mm_dtype = jnp.bfloat16 if use_bf16_matmul else jnp.float32
    g_dtype = embedding.dtype
    out_dtype = jnp.result_type(latents.dtype, embedding.dtype)

    # ---- tile selection -------------------------------------------------------------
    D_lane = _round_up(D, 128)                      # lanes a (*, D) block occupies in VMEM
    x_item = jnp.dtype(latents.dtype).itemsize
    q_item = jnp.dtype(out_dtype).itemsize
    mm_item = jnp.dtype(mm_dtype).itemsize
    g_item = jnp.dtype(g_dtype).itemsize

    tile = min(_round_up(max(8, int(tile_n)), 8), _round_up(N, 8))
    if N > 8:  # >= 2 token tiles so a v7x megacore can shard the "parallel" axis
        tile = min(tile, _round_up((N + 1) // 2, 8))

    K_128 = _round_up(K, 128)
    tk_eff = min(_round_up(max(128, int(tile_k)), 128), K_128)

    def _k_layout(tk):
        kp = _round_up(K_128, tk)
        return kp, kp // tk

    def _vmem_est(tn, tk, nkb_):
        cb_bufs = 1 if (single_buffer_resident and nkb_ == 1) else 2
        return int(
            2 * tn * D_lane * (x_item + q_item)             # x in / q out tiles, double-buffered
            + cb_bufs * tk * D_lane * (mm_item + g_item)    # codebook chunk (dist + gather copies)
            + cb_bufs * tk * 4                              # 0.5*||e||^2 chunk
            + tn * 128 * 4 + tn * D_lane * 4                # scratch: running min + q accumulator
            + 4 * tn * tk * 4                               # dist / iota / onehot working set
            + (2 << 20))                                    # slack

    # Generation-aware budget (~100 MiB on 128 MiB parts, ~51 MiB on a 64 MiB v7x core);
    # tiles shrink to fit instead of clamping the limit below the real requirement.
    budget = max((4 * _vmem_capacity_bytes()) // 5, 24 * 1024 * 1024)
    K_pad, nkb = _k_layout(tk_eff)
    while _vmem_est(tile, tk_eff, nkb) > budget:
        if tk_eff > 512:
            tk_eff //= 2
        elif tile > 256:
            tile = max(8, _round_up(tile // 2, 8))
        elif tk_eff > 128:
            tk_eff //= 2
        elif tile > 8:
            tile = max(8, _round_up(tile // 2, 8))
        else:
            break
        K_pad, nkb = _k_layout(tk_eff)

    N_pad = _round_up(N, tile)
    num_tiles = N_pad // tile
    n_rem = N % tile

    # ---- operand layout glue (stays in XLA) ------------------------------------------
    # Token stream: native dtype, UNPADDED along D -> minimal HBM traffic.
    x_tok = jnp.transpose(latents, (0, 2, 3, 1)).reshape(N, D)
    x_tok = jnp.pad(x_tok, ((0, N_pad - N), (0, 0)))
    e_g = jnp.pad(embedding, ((0, K_pad - K), (0, 0)))          # native dtype (exact gather)
    e_mm = e_g.astype(mm_dtype)                                 # pre-cast copy for the distance matmul
    e2h = 0.5 * jnp.sum(embedding.astype(jnp.float32) ** 2, axis=-1)
    # Padded codebook rows get a huge half-norm so they never win the argmin.
    e2h = jnp.pad(e2h, (0, K_pad - K), constant_values=1e30).reshape(1, K_pad)

    cb_refetch = num_tiles if nkb > 1 else 1
    cost = pl.CostEstimate(
        flops=4 * N_pad * K_pad * D,                            # distance + one-hot gather
        transcendentals=0,
        bytes_accessed=int(N_pad * D * (x_item + q_item)
                           + cb_refetch * K_pad * (D * (mm_item + g_item) + 4)
                           + num_tiles * 4))

    resident = single_buffer_resident and nkb == 1

    def _cb_spec(shape, imap):
        if resident:  # constant block index -> one buffer is enough (halves codebook VMEM)
            return pl.BlockSpec(shape, imap, pipeline_mode=pl.Buffered(1))
        return pl.BlockSpec(shape, imap)

    kernel = functools.partial(_vq_kernel, n_rem=n_rem)

    q_tok, sse_parts = pl.pallas_call(
        kernel,
        out_shape=(
            jax.ShapeDtypeStruct((N_pad, D), out_dtype),
            jax.ShapeDtypeStruct((num_tiles, 1, 1), jnp.float32),
        ),
        grid_spec=pltpu.PrefetchScalarGridSpec(
            num_scalar_prefetch=0,
            grid=(num_tiles, nkb),
            in_specs=[
                _cb_spec((tk_eff, D), lambda i, k: (k, 0)),       # codebook (matmul dtype)
                _cb_spec((tk_eff, D), lambda i, k: (k, 0)),       # codebook (gather / native dtype)
                _cb_spec((1, tk_eff), lambda i, k: (0, k)),       # 0.5*||e||^2
                pl.BlockSpec((tile, D), lambda i, k: (i, 0)),     # token tile (native dtype)
            ],
            out_specs=[
                pl.BlockSpec((tile, D), lambda i, k: (i, 0)),     # quantized tokens
                pl.BlockSpec((1, 1, 1), lambda i, k: (i, 0, 0)),  # per-tile partial SSE
            ],
            scratch_shapes=[
                pltpu.VMEM((tile, 1), jnp.float32),               # running min distance
                pltpu.VMEM((tile, D), jnp.float32),               # running quantized rows
            ],
        ),
        compiler_params=pltpu.CompilerParams(
            dimension_semantics=("parallel", "arbitrary"),
            vmem_limit_bytes=int(budget),
        ),
        cost_estimate=cost,
    )(e_mm, e_g, e2h, x_tok)

    # Glue: (N_pad, D) -> (N, D) -> NCHW.
    quantized = jnp.transpose(q_tok[:N].reshape(B, H, W, D), (0, 3, 1, 2))

    mse = jnp.sum(sse_parts) / jnp.float32(N * D)
    # Forward value: codebook_loss + commitment_cost * commitment_loss, both equal to
    # MSE(latents, quantized) in the forward pass.
    vq_loss = (1.0 + commitment_cost) * mse

    # Straight-through estimator: forward value is simply the quantized latents.
    # TODO(synk): detach/STE gradient semantics are not represented in this forward-only kernel.
    return quantized, vq_loss


def _reference_forward(latents, embedding, commitment_cost=0.25):
    # Pure-JAX reference mirroring the PyTorch module's forward values.
    x = jnp.transpose(latents, (0, 2, 3, 1))                               # (B,H,W,D)
    dist = jnp.linalg.norm(x[..., None, :] - embedding[None, None, None], axis=-1)
    idx = jnp.argmin(dist, axis=-1)                                        # (B,H,W)
    q = embedding[idx]                                                     # (B,H,W,D)
    q = jnp.transpose(q, (0, 3, 1, 2))                                     # (B,D,H,W)
    mse = jnp.mean((latents - q) ** 2)
    return q, (1.0 + commitment_cost) * mse


if __name__ == "__main__":
    key = jax.random.PRNGKey(0)
    k_lat, k_emb = jax.random.split(key)

    B, D, H, W = 2, 32, 8, 8          # latents NCHW, embedding_dim = 32
    K = 16                            # num_embeddings

    latents = jax.random.normal(k_lat, (B, D, H, W), dtype=jnp.float32)
    # nn.init.uniform_(weight, -1/K, 1/K), deterministic here.
    embedding = jax.random.uniform(
        k_emb, (K, D), dtype=jnp.float32, minval=-1.0 / K, maxval=1.0 / K)

    try:
        q, vq_loss = vector_quantizer_forward(latents, embedding)
        jax.block_until_ready((q, vq_loss))
    except Exception:
        # pl.Buffered(1) single-buffering unavailable in this jax build -> plain specs.
        q, vq_loss = vector_quantizer_forward(latents, embedding,
                                              single_buffer_resident=False)
        jax.block_until_ready((q, vq_loss))

    q_ref, loss_ref = _reference_forward(latents, embedding)
    assert q.shape == (B, D, H, W)

    # Tie-robust correctness check: the bf16 distance matmul may legitimately pick a
    # different code on near-ties, so verify (a) every quantized row is an exact codebook
    # row, (b) its distance to the latent is (near-)optimal, (c) the loss matches.
    x_tok = jnp.transpose(latents, (0, 2, 3, 1)).reshape(-1, D)
    q_chk = jnp.transpose(q, (0, 2, 3, 1)).reshape(-1, D)
    row_err = jnp.min(jnp.max(jnp.abs(q_chk[:, None, :] - embedding[None]), axis=-1), axis=-1)
    assert float(jnp.max(row_err)) <= 1e-5, "quantized rows are not codebook rows"
    d_sel = jnp.sum((x_tok - q_chk) ** 2, axis=-1)
    d_opt = jnp.min(jnp.sum((x_tok[:, None, :] - embedding[None]) ** 2, axis=-1), axis=-1)
    assert float(jnp.max(d_sel - d_opt)) <= 2e-2, "selected codes are not (near-)nearest"
    assert jnp.allclose(vq_loss, loss_ref, rtol=2e-3, atol=1e-3), "vq loss mismatch"

    print("KERNEL_OK")
</pallas_src>

<mosaic_0001>
module attributes {stable_mosaic.version = 11 : i64} {
  func.func @_vq_kernel(%arg0: i32, %arg1: i32, %arg2: memref<128x32xbf16, #tpu.memory_space<vmem>>, %arg3: memref<128x32xf32, #tpu.memory_space<vmem>>, %arg4: memref<1x128xf32, #tpu.memory_space<vmem>>, %arg5: memref<64x32xf32, #tpu.memory_space<vmem>>, %arg6: memref<64x32xf32, #tpu.memory_space<vmem>>, %arg7: memref<1x1x1xf32, #tpu.memory_space<vmem>>, %arg8: memref<64x1xf32, #tpu.memory_space<vmem>>, %arg9: memref<64x32xf32, #tpu.memory_space<vmem>>) attributes {dimension_semantics = [#tpu.dimension_semantics<parallel>, #tpu.dimension_semantics<arbitrary>], iteration_bounds = array<i64: 2, 1>, scalar_prefetch = 0 : i64, scratch_operands = 2 : i64, tpu.core_type = #tpu.core_type<tc>, window_params = [{pipeline_mode = #tpu.pipeline_mode<synchronous>, transform_indices = @transform_0, window_bounds = array<i64: 128, 32>}, {pipeline_mode = #tpu.pipeline_mode<synchronous>, transform_indices = @transform_1, window_bounds = array<i64: 128, 32>}, {pipeline_mode = #tpu.pipeline_mode<synchronous>, transform_indices = @transform_2, window_bounds = array<i64: 1, 128>}, {transform_indices = @transform_3, window_bounds = array<i64: 64, 32>}, {transform_indices = @transform_4, window_bounds = array<i64: 64, 32>}, {transform_indices = @transform_5, window_bounds = array<i64: 1, 1, 1>}]} {
    %c0 = arith.constant 0 : index
    %c0_0 = arith.constant 0 : index
    %0 = vector.load %arg5[%c0, %c0_0] : memref<64x32xf32, #tpu.memory_space<vmem>>, vector<64x32xf32>
    %c0_1 = arith.constant 0 : index
    %c0_2 = arith.constant 0 : index
    %1 = vector.load %arg2[%c0_1, %c0_2] : memref<128x32xbf16, #tpu.memory_space<vmem>>, vector<128x32xbf16>
    %c0_i32 = arith.constant 0 : i32
    %2 = arith.cmpi eq, %arg1, %c0_i32 : i32
    %3 = arith.extui %2 : i1 to i32
    %c0_i32_3 = arith.constant 0 : i32
    %4 = arith.cmpi ne, %3, %c0_i32_3 : i32
    scf.if %4 {
      %cst_23 = arith.constant 0x7F800000 : f32
      %38 = vector.broadcast %cst_23 : f32 to vector<64x1xf32>
      %c0_24 = arith.constant 0 : index
      %c0_25 = arith.constant 0 : index
      %39 = vector.load %arg8[%c0_24, %c0_25] : memref<64x1xf32, #tpu.memory_space<vmem>>, vector<64x1xf32>
      tpu.vector_store %arg8[%c0_24, %c0_25], %38 {strides = array<i32>} : memref<64x1xf32, #tpu.memory_space<vmem>>, vector<64x1xf32>,
    } else {
    }
    %5 = arith.truncf %0 : vector<64x32xf32> to vector<64x32xbf16>
    %cst = arith.constant dense<0.000000e+00> : vector<64x128xf32>
    %6 = tpu.matmul %5, %1, %cst {dimension_numbers = #tpu.dot_dimension_numbers<[1], [1], [0], [0], [0, 0, 1, 0], [], []>} : vector<64x32xbf16>, vector<128x32xbf16>, vector<64x128xf32> -> vector<64x128xf32>
    %c0_4 = arith.constant 0 : index
    %c0_5 = arith.constant 0 : index
    %7 = vector.load %arg4[%c0_4, %c0_5] : memref<1x128xf32, #tpu.memory_space<vmem>>, vector<1x128xf32>
    %8 = vector.broadcast %7 : vector<1x128xf32> to vector<64x128xf32>
    %9 = arith.subf %8, %6 : vector<64x128xf32>
    %cst_6 = arith.constant dense<0x7F800000> : vector<64xf32>
    %10 = vector.multi_reduction <minimumf>, %9, %cst_6 [1] : vector<64x128xf32> to vector<64xf32>
    %11 = vector.shape_cast %10 : vector<64xf32> to vector<64x1xf32>
    %12 = tpu.iota {dimensions = array<i32: 1>} : vector<64x128xi32>
    %13 = vector.broadcast %11 : vector<64x1xf32> to vector<64x128xf32>
    %14 = arith.cmpf ole, %9, %13 : vector<64x128xf32>
    %c128_i32 = arith.constant 128 : i32
    %15 = vector.broadcast %c128_i32 : i32 to vector<64x128xi32>
    %16 = arith.select %14, %12, %15 : vector<64x128xi1>, vector<64x128xi32>
    %cst_7 = arith.constant dense<2147483647> : vector<64xi32>
    %17 = vector.multi_reduction <minsi>, %16, %cst_7 [1] : vector<64x128xi32> to vector<64xi32>
    %18 = vector.shape_cast %17 : vector<64xi32> to vector<64x1xi32>
    %19 = vector.broadcast %18 : vector<64x1xi32> to vector<64x128xi32>
    %20 = arith.cmpi eq, %12, %19 : vector<64x128xi32>
    %c0_8 = arith.constant 0 : index
    %c0_9 = arith.constant 0 : index
    %21 = vector.load %arg3[%c0_8, %c0_9] : memref<128x32xf32, #tpu.memory_space<vmem>>, vector<128x32xf32>
    %22 = arith.extui %20 : vector<64x128xi1> to vector<64x128xi32>
    %23 = arith.sitofp %22 : vector<64x128xi32> to vector<64x128xf32>
    %cst_10 = arith.constant dense<0.000000e+00> : vector<64x32xf32>
    %24 = tpu.matmul %23, %21, %cst_10 {dimension_numbers = #tpu.dot_dimension_numbers<[1], [0], [0], [1], [0, 0, 1, 1], [], []>} : vector<64x128xf32>, vector<128x32xf32>, vector<64x32xf32> -> vector<64x32xf32>
    %c0_11 = arith.constant 0 : index
    %c0_12 = arith.constant 0 : index
    %25 = vector.load %arg8[%c0_11, %c0_12] : memref<64x1xf32, #tpu.memory_space<vmem>>, vector<64x1xf32>
    %26 = arith.cmpf olt, %11, %25 : vector<64x1xf32>
    %c0_13 = arith.constant 0 : index
    %c0_14 = arith.constant 0 : index
    %27 = vector.load %arg8[%c0_13, %c0_14] : memref<64x1xf32, #tpu.memory_space<vmem>>, vector<64x1xf32>
    %28 = arith.select %26, %11, %27 : vector<64x1xi1>, vector<64x1xf32>
    %c0_15 = arith.constant 0 : index
    %c0_16 = arith.constant 0 : index
    %29 = vector.load %arg8[%c0_15, %c0_16] : memref<64x1xf32, #tpu.memory_space<vmem>>, vector<64x1xf32>
    tpu.vector_store %arg8[%c0_15, %c0_16], %28 {strides = array<i32>} : memref<64x1xf32, #tpu.memory_space<vmem>>, vector<64x1xf32>,
    %c0_17 = arith.constant 0 : index
    %c0_18 = arith.constant 0 : index
    %30 = vector.load %arg9[%c0_17, %c0_18] : memref<64x32xf32, #tpu.memory_space<vmem>>, vector<64x32xf32>
    %31 = vector.shape_cast %26 : vector<64x1xi1> to vector<64x1xi1>
    %32 = vector.broadcast %31 : vector<64x1xi1> to vector<64x32xi1>
    %33 = arith.select %32, %24, %30 : vector<64x32xi1>, vector<64x32xf32>
    %c0_19 = arith.constant 0 : index
    %c0_20 = arith.constant 0 : index
    %34 = vector.load %arg9[%c0_19, %c0_20] : memref<64x32xf32, #tpu.memory_space<vmem>>, vector<64x32xf32>
    tpu.vector_store %arg9[%c0_19, %c0_20], %33 {strides = array<i32>} : memref<64x32xf32, #tpu.memory_space<vmem>>, vector<64x32xf32>,
    %c0_i32_21 = arith.constant 0 : i32
    %35 = arith.cmpi eq, %arg1, %c0_i32_21 : i32
    %36 = arith.extui %35 : i1 to i32
    %c0_i32_22 = arith.constant 0 : i32
    %37 = arith.cmpi ne, %36, %c0_i32_22 : i32
    scf.if %37 {
      %c0_23 = arith.constant 0 : index
      %c0_24 = arith.constant 0 : index
      %38 = vector.load %arg9[%c0_23, %c0_24] : memref<64x32xf32, #tpu.memory_space<vmem>>, vector<64x32xf32>
      %c0_25 = arith.constant 0 : index
      %c0_26 = arith.constant 0 : index
      %39 = vector.load %arg6[%c0_25, %c0_26] : memref<64x32xf32, #tpu.memory_space<vmem>>, vector<64x32xf32>
      tpu.vector_store %arg6[%c0_25, %c0_26], %38 {strides = array<i32>} : memref<64x32xf32, #tpu.memory_space<vmem>>, vector<64x32xf32>,
      %40 = arith.subf %0, %38 : vector<64x32xf32>
      %41 = arith.mulf %40, %40 : vector<64x32xf32>
      %42 = vector.shape_cast %41 : vector<64x32xf32> to vector<1x64x32xf32>
      %cst_27 = arith.constant dense<0.000000e+00> : vector<1xf32>
      %43 = vector.multi_reduction <add>, %42, %cst_27 [1, 2] : vector<1x64x32xf32> to vector<1xf32>
      %44 = vector.shape_cast %43 : vector<1xf32> to vector<1x1x1xf32>
      %45 = vector.extract %44[0, 0, 0] : f32 from vector<1x1x1xf32>
      %46 = vector.broadcast %45 : f32 to vector<1x1x1xf32>
      %c0_28 = arith.constant 0 : index
      %c0_29 = arith.constant 0 : index
      %c0_30 = arith.constant 0 : index
      %47 = vector.load %arg7[%c0_28, %c0_29, %c0_30] : memref<1x1x1xf32, #tpu.memory_space<vmem>>, vector<1x1x1xf32>
      tpu.vector_store %arg7[%c0_28, %c0_29, %c0_30], %46 {strides = array<i32>} : memref<1x1x1xf32, #tpu.memory_space<vmem>>, vector<1x1x1xf32>,
    } else {
    }
    return
  }
  func.func @transform_0(%arg0: i32, %arg1: i32) -> (i32, i32) {
    %c0_i32 = arith.constant 0 : i32
    %c0_i32_0 = arith.constant 0 : i32
    return %arg1, %c0_i32 : i32, i32
  }
  func.func @transform_1(%arg0: i32, %arg1: i32) -> (i32, i32) {
    %c0_i32 = arith.constant 0 : i32
    %c0_i32_0 = arith.constant 0 : i32
    return %arg1, %c0_i32 : i32, i32
  }
  func.func @transform_2(%arg0: i32, %arg1: i32) -> (i32, i32) {
    %c0_i32 = arith.constant 0 : i32
    %c0_i32_0 = arith.constant 0 : i32
    return %c0_i32, %arg1 : i32, i32
  }
  func.func @transform_3(%arg0: i32, %arg1: i32) -> (i32, i32) {
    %c0_i32 = arith.constant 0 : i32
    %c0_i32_0 = arith.constant 0 : i32
    return %arg0, %c0_i32 : i32, i32
  }
  func.func @transform_4(%arg0: i32, %arg1: i32) -> (i32, i32) {
    %c0_i32 = arith.constant 0 : i32
    %c0_i32_0 = arith.constant 0 : i32
    return %arg0, %c0_i32 : i32, i32
  }
  func.func @transform_5(%arg0: i32, %arg1: i32) -> (i32, i32, i32) {
    %c0_i32 = arith.constant 0 : i32
    %c0_i32_0 = arith.constant 0 : i32
    %c0_i32_1 = arith.constant 0 : i32
    return %arg0, %c0_i32, %c0_i32_0 : i32, i32, i32
  }
}

module attributes {stable_mosaic.version = 11 : i64} {
  func.func @_vq_kernel(%arg0: i32, %arg1: i32, %arg2: memref<128x32xbf16, #tpu.memory_space<vmem>>, %arg3: memref<128x32xf32, #tpu.memory_space<vmem>>, %arg4: memref<1x128xf32, #tpu.memory_space<vmem>>, %arg5: memref<64x32xf32, #tpu.memory_space<vmem>>, %arg6: memref<64x32xf32, #tpu.memory_space<vmem>>, %arg7: memref<1x1x1xf32, #tpu.memory_space<vmem>>, %arg8: memref<64x1xf32, #tpu.memory_space<vmem>>, %arg9: memref<64x32xf32, #tpu.memory_space<vmem>>) attributes {dimension_semantics = [#tpu.dimension_semantics<parallel>, #tpu.dimension_semantics<arbitrary>], iteration_bounds = array<i64: 2, 1>, scalar_prefetch = 0 : i64, scratch_operands = 2 : i64, tpu.core_type = #tpu.core_type<tc>, window_params = [{transform_indices = @transform_0, window_bounds = array<i64: 128, 32>}, {transform_indices = @transform_1, window_bounds = array<i64: 128, 32>}, {transform_indices = @transform_2, window_bounds = array<i64: 1, 128>}, {transform_indices = @transform_3, window_bounds = array<i64: 64, 32>}, {transform_indices = @transform_4, window_bounds = array<i64: 64, 32>}, {transform_indices = @transform_5, window_bounds = array<i64: 1, 1, 1>}]} {
    %c0 = arith.constant 0 : index
    %c0_0 = arith.constant 0 : index
    %0 = vector.load %arg5[%c0, %c0_0] : memref<64x32xf32, #tpu.memory_space<vmem>>, vector<64x32xf32>
    %c0_1 = arith.constant 0 : index
    %c0_2 = arith.constant 0 : index
    %1 = vector.load %arg2[%c0_1, %c0_2] : memref<128x32xbf16, #tpu.memory_space<vmem>>, vector<128x32xbf16>
    %c0_i32 = arith.constant 0 : i32
    %2 = arith.cmpi eq, %arg1, %c0_i32 : i32
    %3 = arith.extui %2 : i1 to i32
    %c0_i32_3 = arith.constant 0 : i32
    %4 = arith.cmpi ne, %3, %c0_i32_3 : i32
    scf.if %4 {
      %cst_23 = arith.constant 0x7F800000 : f32
      %38 = vector.broadcast %cst_23 : f32 to vector<64x1xf32>
      %c0_24 = arith.constant 0 : index
      %c0_25 = arith.constant 0 : index
      %39 = vector.load %arg8[%c0_24, %c0_25] : memref<64x1xf32, #tpu.memory_space<vmem>>, vector<64x1xf32>
      tpu.vector_store %arg8[%c0_24, %c0_25], %38 {strides = array<i32>} : memref<64x1xf32, #tpu.memory_space<vmem>>, vector<64x1xf32>,
    } else {
    }
    %5 = arith.truncf %0 : vector<64x32xf32> to vector<64x32xbf16>
    %cst = arith.constant dense<0.000000e+00> : vector<64x128xf32>
    %6 = tpu.matmul %5, %1, %cst {dimension_numbers = #tpu.dot_dimension_numbers<[1], [1], [0], [0], [0, 0, 1, 0], [], []>} : vector<64x32xbf16>, vector<128x32xbf16>, vector<64x128xf32> -> vector<64x128xf32>
    %c0_4 = arith.constant 0 : index
    %c0_5 = arith.constant 0 : index
    %7 = vector.load %arg4[%c0_4, %c0_5] : memref<1x128xf32, #tpu.memory_space<vmem>>, vector<1x128xf32>
    %8 = vector.broadcast %7 : vector<1x128xf32> to vector<64x128xf32>
    %9 = arith.subf %8, %6 : vector<64x128xf32>
    %cst_6 = arith.constant dense<0x7F800000> : vector<64xf32>
    %10 = vector.multi_reduction <minimumf>, %9, %cst_6 [1] : vector<64x128xf32> to vector<64xf32>
    %11 = vector.shape_cast %10 : vector<64xf32> to vector<64x1xf32>
    %12 = tpu.iota {dimensions = array<i32: 1>} : vector<64x128xi32>
    %13 = vector.broadcast %11 : vector<64x1xf32> to vector<64x128xf32>
    %14 = arith.cmpf ole, %9, %13 : vector<64x128xf32>
    %c128_i32 = arith.constant 128 : i32
    %15 = vector.broadcast %c128_i32 : i32 to vector<64x128xi32>
    %16 = arith.select %14, %12, %15 : vector<64x128xi1>, vector<64x128xi32>
    %cst_7 = arith.constant dense<2147483647> : vector<64xi32>
    %17 = vector.multi_reduction <minsi>, %16, %cst_7 [1] : vector<64x128xi32> to vector<64xi32>
    %18 = vector.shape_cast %17 : vector<64xi32> to vector<64x1xi32>
    %19 = vector.broadcast %18 : vector<64x1xi32> to vector<64x128xi32>
    %20 = arith.cmpi eq, %12, %19 : vector<64x128xi32>
    %c0_8 = arith.constant 0 : index
    %c0_9 = arith.constant 0 : index
    %21 = vector.load %arg3[%c0_8, %c0_9] : memref<128x32xf32, #tpu.memory_space<vmem>>, vector<128x32xf32>
    %22 = arith.extui %20 : vector<64x128xi1> to vector<64x128xi32>
    %23 = arith.sitofp %22 : vector<64x128xi32> to vector<64x128xf32>
    %cst_10 = arith.constant dense<0.000000e+00> : vector<64x32xf32>
    %24 = tpu.matmul %23, %21, %cst_10 {dimension_numbers = #tpu.dot_dimension_numbers<[1], [0], [0], [1], [0, 0, 1, 1], [], []>} : vector<64x128xf32>, vector<128x32xf32>, vector<64x32xf32> -> vector<64x32xf32>
    %c0_11 = arith.constant 0 : index
    %c0_12 = arith.constant 0 : index
    %25 = vector.load %arg8[%c0_11, %c0_12] : memref<64x1xf32, #tpu.memory_space<vmem>>, vector<64x1xf32>
    %26 = arith.cmpf olt, %11, %25 : vector<64x1xf32>
    %c0_13 = arith.constant 0 : index
    %c0_14 = arith.constant 0 : index
    %27 = vector.load %arg8[%c0_13, %c0_14] : memref<64x1xf32, #tpu.memory_space<vmem>>, vector<64x1xf32>
    %28 = arith.select %26, %11, %27 : vector<64x1xi1>, vector<64x1xf32>
    %c0_15 = arith.constant 0 : index
    %c0_16 = arith.constant 0 : index
    %29 = vector.load %arg8[%c0_15, %c0_16] : memref<64x1xf32, #tpu.memory_space<vmem>>, vector<64x1xf32>
    tpu.vector_store %arg8[%c0_15, %c0_16], %28 {strides = array<i32>} : memref<64x1xf32, #tpu.memory_space<vmem>>, vector<64x1xf32>,
    %c0_17 = arith.constant 0 : index
    %c0_18 = arith.constant 0 : index
    %30 = vector.load %arg9[%c0_17, %c0_18] : memref<64x32xf32, #tpu.memory_space<vmem>>, vector<64x32xf32>
    %31 = vector.shape_cast %26 : vector<64x1xi1> to vector<64x1xi1>
    %32 = vector.broadcast %31 : vector<64x1xi1> to vector<64x32xi1>
    %33 = arith.select %32, %24, %30 : vector<64x32xi1>, vector<64x32xf32>
    %c0_19 = arith.constant 0 : index
    %c0_20 = arith.constant 0 : index
    %34 = vector.load %arg9[%c0_19, %c0_20] : memref<64x32xf32, #tpu.memory_space<vmem>>, vector<64x32xf32>
    tpu.vector_store %arg9[%c0_19, %c0_20], %33 {strides = array<i32>} : memref<64x32xf32, #tpu.memory_space<vmem>>, vector<64x32xf32>,
    %c0_i32_21 = arith.constant 0 : i32
    %35 = arith.cmpi eq, %arg1, %c0_i32_21 : i32
    %36 = arith.extui %35 : i1 to i32
    %c0_i32_22 = arith.constant 0 : i32
    %37 = arith.cmpi ne, %36, %c0_i32_22 : i32
    scf.if %37 {
      %c0_23 = arith.constant 0 : index
      %c0_24 = arith.constant 0 : index
      %38 = vector.load %arg9[%c0_23, %c0_24] : memref<64x32xf32, #tpu.memory_space<vmem>>, vector<64x32xf32>
      %c0_25 = arith.constant 0 : index
      %c0_26 = arith.constant 0 : index
      %39 = vector.load %arg6[%c0_25, %c0_26] : memref<64x32xf32, #tpu.memory_space<vmem>>, vector<64x32xf32>
      tpu.vector_store %arg6[%c0_25, %c0_26], %38 {strides = array<i32>} : memref<64x32xf32, #tpu.memory_space<vmem>>, vector<64x32xf32>,
      %40 = arith.subf %0, %38 : vector<64x32xf32>
      %41 = arith.mulf %40, %40 : vector<64x32xf32>
      %42 = vector.shape_cast %41 : vector<64x32xf32> to vector<1x64x32xf32>
      %cst_27 = arith.constant dense<0.000000e+00> : vector<1xf32>
      %43 = vector.multi_reduction <add>, %42, %cst_27 [1, 2] : vector<1x64x32xf32> to vector<1xf32>
      %44 = vector.shape_cast %43 : vector<1xf32> to vector<1x1x1xf32>
      %45 = vector.extract %44[0, 0, 0] : f32 from vector<1x1x1xf32>
      %46 = vector.broadcast %45 : f32 to vector<1x1x1xf32>
      %c0_28 = arith.constant 0 : index
      %c0_29 = arith.constant 0 : index
      %c0_30 = arith.constant 0 : index
      %47 = vector.load %arg7[%c0_28, %c0_29, %c0_30] : memref<1x1x1xf32, #tpu.memory_space<vmem>>, vector<1x1x1xf32>
      tpu.vector_store %arg7[%c0_28, %c0_29, %c0_30], %46 {strides = array<i32>} : memref<1x1x1xf32, #tpu.memory_space<vmem>>, vector<1x1x1xf32>,
    } else {
    }
    return
  }
  func.func @transform_0(%arg0: i32, %arg1: i32) -> (i32, i32) {
    %c0_i32 = arith.constant 0 : i32
    %c0_i32_0 = arith.constant 0 : i32
    return %arg1, %c0_i32 : i32, i32
  }
  func.func @transform_1(%arg0: i32, %arg1: i32) -> (i32, i32) {
    %c0_i32 = arith.constant 0 : i32
    %c0_i32_0 = arith.constant 0 : i32
    return %arg1, %c0_i32 : i32, i32
  }
  func.func @transform_2(%arg0: i32, %arg1: i32) -> (i32, i32) {
    %c0_i32 = arith.constant 0 : i32
    %c0_i32_0 = arith.constant 0 : i32
    return %c0_i32, %arg1 : i32, i32
  }
  func.func @transform_3(%arg0: i32, %arg1: i32) -> (i32, i32) {
    %c0_i32 = arith.constant 0 : i32
    %c0_i32_0 = arith.constant 0 : i32
    return %arg0, %c0_i32 : i32, i32
  }
  func.func @transform_4(%arg0: i32, %arg1: i32) -> (i32, i32) {
    %c0_i32 = arith.constant 0 : i32
    %c0_i32_0 = arith.constant 0 : i32
    return %arg0, %c0_i32 : i32, i32
  }
  func.func @transform_5(%arg0: i32, %arg1: i32) -> (i32, i32, i32) {
    %c0_i32 = arith.constant 0 : i32
    %c0_i32_0 = arith.constant 0 : i32
    %c0_i32_1 = arith.constant 0 : i32
    return %arg0, %c0_i32, %c0_i32_0 : i32, i32, i32
  }
}

</mosaic_0001>

<bundles_post_ra>
// kernel: vector_quantizer_forward.1
= control target key start
LH: loop header
LB: loop body
LE: loop exit
PB: predicated region body
PF: predicated region fallthrough
CT: control target
= control target key end

     0   :  { %11 = vsyncpa [#allocation5], 0  ;;  %s2015_s0 = inlined_call_operand.vmem [shape: bf16[128,32], index: 0, kind: input, shape index: {}]   ;;  %s2016_s1 = inlined_call_operand.vmem [shape: f32[128,32], index: 1, kind: input, shape index: {}]   ;;  %s2017_s2 = inlined_call_operand.vmem [shape: f32[1,128], index: 2, kind: input, shape index: {}]   ;;  %s2018_s3 = inlined_call_operand.vmem [shape: f32[128,32], index: 3, kind: input, shape index: {}]   ;;  %s2019_s4 = inlined_call_operand.hbm [shape: f32[128,32], index: 4, kind: output, shape index: {0}]   ;;  %s2020_s5 = inlined_call_operand.vmem [shape: f32[2,1,1], index: 5, kind: output, shape index: {1}]  }
   0x1   :  { %13 = vsyncpa [#allocation5 + $0x1], 0  ;;  %s1449_s18 = smov 0   ;;  %s1451_s19 = smov 0  }
   0x2   :  { %s1453_s20 = smov 0   ;;  %s1455_s21 = smov 0  }
   0x3   :  { %s1457_s22 = smov 0   ;;  %s1459_s23 = smov 0  }
   0x4 LB: > { %s1105_s24 = sadd.s32 4294967295, %s1411_s23   ;;  %s1106_s25 = sadd.s32 4294967294, %s1411_s23   ;;  %s1411_s23 = sphi %s1459_s23, %s19_s23   ;;  %s1407_s22 = sphi %s1457_s22, %s2027_s22   ;;  %s1403_s21 = sphi %s1455_s21, %s2026_s21   ;;  %s1399_s20 = sphi %s1453_s20, %s2025_s20   ;;  %s1395_s19 = sphi %s1451_s19, %s2024_s19   ;;  %s1391_s18 = sphi %s1449_s18, %s2023_s18  }
   0x5   : > { %s31_s26 = sadd.s32 1, %s1407_s22  ;;  %s142_s27 = sadd.s32 1, %s1399_s20 }
   0x6   : > { %p33_p0 = scmp.ge.s32.totalorder %s31_s26, 2  ;;  %p152_p1 = scmp.ne.s32.totalorder %s1399_s20, %s1395_s19 }
   0x7   : > { %p153_p2 = scmp.eq.s32.totalorder %s1105_s24, 1  ;;  %p158_p3 = scmp.ne.s32.totalorder %s1395_s19, %s1391_s18 }
   0x8   : > { %s2029_s26 = smov (%p33_p0, %s31_s26), 0  ;;  %p159_p5 = scmp.eq.s32.totalorder %s1106_s25, 1 }
   0x9   : > { %p1489_p4 = por %p153_p2, %p152_p1  ;;  %s139_s29 = ssub.s32 %s1407_s22, %s2029_s26 }
   0xa   : > { %p1112_p6 = scmp.ge.s32.totalorder %s1411_s23, 1  ;;  %p140_p7 = scmp.eq.s32.totalorder %s139_s29, 0 }
   0xb   : > { %p1496_p8 = por %p159_p5, %p158_p3  ;;  %p236_p9 = scmp.lt.s32.totalorder %s1411_s23, 3 }
   0xc   : > { %s1502_s6 = scalar_select %p140_p7, %s1399_s20, %s142_s27  }
   0xd   : > { %p237_p10 = pnand %p1112_p6, %p236_p9 }
   0xe   : > { %s1114_s11 = sshll.u32 (!%p237_p10), %s1403_s21, 3  ;;  %s1150_s27 = sshll.u32 (!%p237_p10), %s1403_s21, 10 }
   0xf   : > { %240 = sbr.rel (%p237_p10) target bundleno = 1140 (0x474), region = 36  ;;  %p296_p11 = scmp.lt.s32.totalorder (!%p237_p10), %s1114_s11, 15 }
  0x10   : > { %s1959_s9 = scalar_lea.hbm (!%p237_p10), %s2019_s4, %s1150_s27  ;;  %s1416_s12 = smov (!%p237_p10), [#allocation4]  }
  0x11   : > { %s1339_s13 = sshll.u32 (!%p237_p10), %s1416_s12, 4  ;;  %s1340_s13 = int_to_ptr.vmem [resolvable:$false] %s1339_s13 }
  0x14   : > { %v1327_v0 = vld [vmem:[%s2015_s0 + $0x38] sm:$0xff]   ;;  %vm387_vm0 = vcmask 261120   ;;  %v1328_v1 = vld [vmem:[%s2015_s0 + $0x30] sm:$0xff]   ;;  %v1329_v4 = vld [vmem:[%s2015_s0 + $0x28] sm:$0xff]   ;;  %s2031_s11 = smov (!%p296_p11, %s1114_s11), 15  ;;  %vm334_vm1 = vcmask 7168   ;;  %v520_v47 = vlaneseq }
  0x15   : > { %1255 = vmatprep.subr.msk.bf16.mxu0 %vm387_vm0, %v1327_v0  ;;  %v422_v2 = vsel %vm387_vm0, %v1327_v0, 0  ;;  %v419_v3 = vsel %vm387_vm0, %v1328_v1, 0  ;;  %s1115_s14 = sshll.u32 %s2031_s11, 3  ;;  %v416_v8 = vsel %vm387_vm0, %v1329_v4, 0  ;;  %v1330_v9 = vld [vmem:[%s2015_s0 + $0x20] sm:$0xff]   ;;  %v1331_v11 = vld [vmem:[%s2015_s0 + $0x18] sm:$0xff]  }
  0x16   : > { %1188 = vmatpush3.bf16.xpose.msra.mxu0 %v422_v2  ;;  %s1522_s17 = scalar_lea.vmem %s2018_s3, %s1115_s14  ;;  %v413_v10 = vsel %vm387_vm0, %v1330_v9, 0  ;;  %v410_v12 = vsel %vm387_vm0, %v1331_v11, 0  ;;  %v1332_v13 = vld [vmem:[%s2015_s0 + $0x10] sm:$0xff]   ;;  %v1333_v15 = vld [vmem:[%s2015_s0 + $0x8] sm:$0xff]   ;;  %v1334_v17 = vld [vmem:[%s2015_s0] sm:$0xff]   ;;  %v1413_v36 = vmov inf  }
  0x17   : > { %1256 = vmatprep.subr.msk.bf16.mxu0 %vm387_vm0, %v1328_v1  ;;  %v1525_v5 = vld [vmem:[%s1522_s17] sm:$0xff]  ;;  %v1528_v6 = vld [vmem:[%s1522_s17 + $0x8] sm:$0xff]  ;;  %v407_v14 = vsel %vm387_vm0, %v1332_v13, 0  ;;  %v404_v16 = vsel %vm387_vm0, %v1333_v15, 0  ;;  %v401_v18 = vsel %vm387_vm0, %v1334_v17, 0  ;;  %v1560_v19 = vld [vmem:[%s1522_s17 + $0x10] sm:$0xff] }
  0x18   : > { %v343_v7 = vpack.c.bf16 %v1528_v6, %v1525_v5  ;;  %v1563_v20 = vld [vmem:[%s1522_s17 + $0x18] sm:$0xff]  ;;  %v1566_v21 = vld [vmem:[%s1522_s17 + $0x20] sm:$0xff]  ;;  %v1569_v22 = vld [vmem:[%s1522_s17 + $0x28] sm:$0xff]  ;;  %336 = vst.msk [vmem:[#allocation2 + $0x8] sm:$0xff] %vm334_vm1, %v1413_v36  ;;  %v1414_v45 = vmov 0   ;;  %v1610_v49 = vand.u32 127, %v520_v47 }
  0x19   : > { %v344_v23 = vpack.c.bf16 %v1563_v20, %v1560_v19  ;;  %v345_v24 = vpack.c.bf16 %v1569_v22, %v1566_v21  ;;  %v1578_v25 = vld [vmem:[%s1522_s17 + $0x30] sm:$0xff]  ;;  %v1581_v26 = vld [vmem:[%s1522_s17 + $0x38] sm:$0xff]  ;;  %v1128_v28 = vld [vmem:[%s2017_s2] ss:$0 sm:$0xff]  ;;  %335 = vst.msk [vmem:[#allocation2] sm:$0xff] %vm334_vm1, %v1413_v36  ;;  %1326 = vset.pattern.permute.xlu1 %v1414_v45  ;;  %1325 = vset.pattern.permute.xlu0 %v1414_v45  ;;  %s272_s17 = sand.u32 1, %s1395_s19  }
  0x1a   : > { %1203 = vmatprep.mubr.msk.bf16.mxu0 %vm387_vm0, %v343_v7  ;;  %v346_v27 = vpack.c.bf16 %v1581_v26, %v1578_v25  ;;  %337 = vst.msk [vmem:[#allocation2 + $0x10] sm:$0xff] %vm334_vm1, %v1413_v36  ;;  %338 = vst.msk [vmem:[#allocation2 + $0x18] sm:$0xff] %vm334_vm1, %v1413_v36  ;;  %v668_v47 = vld [vmem:[%s2016_s1 + $0x50] sm:$0xff]  ;;  %s1113_s24 = sshll.u32 %s272_s17, 6  ;;  %s1965_s10 = scalar_lea.sflag [#allocation5], %s272_s17 }
  0x1b   : > { %339 = vst.msk [vmem:[#allocation2 + $0x20] sm:$0xff] %vm334_vm1, %v1413_v36  ;;  %340 = vst.msk [vmem:[#allocation2 + $0x28] sm:$0xff] %vm334_vm1, %v1413_v36  ;;  %s1918_s25 = scalar_lea.vmem [#allocation4], %s1113_s24  ;;  %s1341_s14 = scalar_lea.vmem %s1340_s13, 2048 }
  0x1c   : > { %341 = vst.msk [vmem:[#allocation2 + $0x30] sm:$0xff] %vm334_vm1, %v1413_v36  ;;  %342 = vst.msk [vmem:[#allocation2 + $0x38] sm:$0xff] %vm334_vm1, %v1413_v36  ;;  %s971_s29 = sshll.u32 %s1918_s25, 4  ;;  %s1961_s29 = int_to_ptr.vmem [resolvable:$true] %s971_s29 }
  0x1d   : > { %s1335_s11 = scalar_lea.vmem %s1961_s29, 1024  ;;  %p1342_p1 = scmp.lt.s32.totalorder %s1961_s29, %s1340_s13 }
  0x1e   : > { %1190 = vmatpush3.bf16.xpose.msra.mxu0 %v419_v3  ;;  %p1336_p12 = scmp.ne.s32.totalorder %s1961_s29, %s1335_s11  ;;  %p1343_p2 = scmp.lt.s32.totalorder %s1341_s14, %s1335_s11 }
  0x1f   : > { %1257 = vmatprep.subr.msk.bf16.mxu0 %vm387_vm0, %v1329_v4  ;;  %v1647_v60 = vld [vmem:[#allocation2 + $0x8] sm:$0xff] }
  0x20   : > { %v1614_v51 = vld [vmem:[#allocation2] sm:$0xff]  ;;  %p1337_p13 = pnand %p1336_p12, %p1489_p4  ;;  %p1344_p3 = por %p1343_p2, %p1342_p1 }
  0x21   : > { %v1608_v48 = vld [vmem:[#allocation2 + $0x10] sm:$0xff]  ;;  %v1633_v55 = vld [vmem:[#allocation2 + $0x18] sm:$0xff] }
  0x22   : > { %v1671_v3 = vld [vmem:[#allocation2 + $0x20] sm:$0xff]  ;;  %p1338_p0 = pneg %p1337_p13 }
  0x24   : > { %p1345_p5 = pnand %p1344_p3, %p1338_p0 }
  0x26   : > { %1192 = vmatpush3.bf16.xpose.msra.mxu0 %v416_v8 }
  0x27   : > { %1258 = vmatprep.subr.msk.bf16.mxu0 %vm387_vm0, %v1330_v9 }
  0x2e   : > { %1194 = vmatpush3.bf16.xpose.msra.mxu0 %v413_v10 }
  0x2f   : > { %1259 = vmatprep.subr.msk.bf16.mxu0 %vm387_vm0, %v1331_v11 }
  0x36   : > { %1196 = vmatpush3.bf16.xpose.msra.mxu0 %v410_v12 }
  0x37   : > { %1260 = vmatprep.subr.msk.bf16.mxu0 %vm387_vm0, %v1332_v13 }
  0x3e   : > { %1198 = vmatpush3.bf16.xpose.msra.mxu0 %v407_v14 }
  0x3f   : > { %1261 = vmatprep.subr.msk.bf16.mxu0 %vm387_vm0, %v1333_v15  ;;  %v1704_v15 = vld [vmem:[#allocation2 + $0x28] sm:$0xff] }
  0x46   : > { %1200 = vmatpush3.bf16.xpose.msra.mxu0 %v404_v16  ;;  %v1706_v16 = vld [vmem:[#allocation2 + $0x30] sm:$0xff] }
  0x47   : > { %1262 = vmatprep.subr.msk.bf16.mxu0 %vm387_vm0, %v1334_v17 }
  0x4e   : > { %1202 = vmatpush3.bf16.xpose.msra.mxu0 %v401_v18 }
  0x55   : > { %1204 = vmatmul.mubr.msk.bf16.vlgmr.msra.gmra.mxu0 %vm387_vm0, %v344_v23 }
  0x56   : > { %1207 = vmatprep.mubr.msk.bf16.mxu0 %vm387_vm0, %v345_v24 }
  0x5d   : > { %1208 = vmatmul.mubr.msk.bf16.gmra.mxu0 %vm387_vm0, %v346_v27 }
 0x115   : > { %v1205_v29 = vpop.f32.mrf.mxu0 }
 0x116   : > { %v498_v30 = vsub.f32 %v1128_v28, %v1205_v29 }
 0x117   : > { %v458_v31 = vpop.f32.mrf.mxu0 }
 0x118   : > { %v496_v32 = vsub.f32 %v1128_v28, %v458_v31  ;;  %508 = vmin.xlane.f32.xlu1 %v498_v30  ;;  %v1734_v31 = vld [vmem:[#allocation2 + $0x38] sm:$0xff] }
 0x119   : > { %v1206_v33 = vpop.f32.mrf.mxu0 }
 0x11a   : > { %v499_v34 = vsub.f32 %v1128_v28, %v1206_v33  ;;  %504 = vmin.xlane.f32.xlu0 %v496_v32 }
 0x11b   : > { %v461_v35 = vpop.f32.mrf.mxu0 }
 0x11c   : > { %v497_v37 = vsub.f32 %v1128_v28, %v461_v35  ;;  %510 = vmin.xlane.f32.xlu1 %v499_v34 }
 0x11d   : > { %v1209_v38 = vpop.f32.mrf.mxu0 }
 0x11e   : > { %506 = vmin.xlane.f32.xlu0 %v497_v37  ;;  %v1597_v43 = vsub.f32 %v1128_v28, %v1209_v38 }
 0x11f   : > { %v474_v39 = vpop.f32.mrf.mxu0 }
 0x120   : > { %v500_v40 = vsub.f32 %v1128_v28, %v474_v39 }
 0x121   : > { %v1210_v41 = vpop.f32.mrf.mxu0 }
 0x122   : > { %512 = vmin.xlane.f32.xlu0 %v500_v40  ;;  %v1605_v46 = vsub.f32 %v1128_v28, %v1210_v41  ;;  %v673_v41 = vld [vmem:[%s2016_s1 + $0x78] sm:$0xff] }
 0x123   : > { %v477_v42 = vpop.f32.mrf.mxu0  ;;  %1211 = vmatprep.subr.mxu1 %v673_v41 }
 0x124   : > { %v1599_v44 = vsub.f32 %v1128_v28, %v477_v42  ;;  %v672_v42 = vld [vmem:[%s2016_s1 + $0x70] sm:$0xff]  ;;  %1212 = vmatpush3.msra.mxu1 %v673_v41 }
 0x125   : > { %1213 = vmatprep.subr.mxu1 %v672_v42 }
 0x126   : > { %516 = vmin.xlane.f32.xlu0 %v1597_v43  ;;  %514 = vmin.xlane.f32.xlu1 %v1599_v44 }
 0x127   : > { %1214 = vmatpush3.msra.mxu1 %v672_v42 }
 0x12a   : > { %518 = vmin.xlane.f32.xlu1 %v1605_v46 }
 0x1a1   : > { %v1612_v50 = vpop.xlane.xlu1 %508 }
 0x1a2   : > { %vm524_vm2 = vcmp.le.f32.partialorder %v498_v30, %v1612_v50  ;;  %vm805_vm3 = vcmp.lt.f32.partialorder %v1612_v50, %v1608_v48 }
 0x1a3   : > { %v1619_v52 = vpop.xlane.xlu0 %504  ;;  %v813_v53 = vsel %vm805_vm3, %v1612_v50, %v1608_v48  ;;  %v1628_v54 = vsel %vm524_vm2, %v1610_v49, 128 }
 0x1a4   : > { %vm522_vm4 = vcmp.le.f32.partialorder %v496_v32, %v1619_v52  ;;  %vm803_vm5 = vcmp.lt.f32.partialorder %v1619_v52, %v1614_v51  ;;  %822 = vst.msk [vmem:[#allocation2 + $0x10] sm:$0xff] %vm334_vm1, %v813_v53  ;;  %v567_v62 = vshra.s32 %v1628_v54, 16  ;;  %v667_v53 = vld [vmem:[%s2016_s1 + $0x48] sm:$0xff] }
 0x1a5   : > { %v1635_v56 = vpop.xlane.xlu1 %510  ;;  %v1638_v57 = vsel %vm522_vm4, %v1610_v49, 128  ;;  %v811_v58 = vsel %vm803_vm5, %v1619_v52, %v1614_v51 }
 0x1a6   : > { %vm525_vm6 = vcmp.le.f32.partialorder %v499_v34, %v1635_v56  ;;  %v539_v59 = vshra.s32 %v1638_v57, 16  ;;  %820 = vst.msk [vmem:[#allocation2] sm:$0xff] %vm334_vm1, %v811_v58  ;;  %vm806_vm7 = vcmp.lt.f32.partialorder %v1635_v56, %v1633_v55  ;;  %v1683_v9 = vcvt.s32.f32 %v567_v62  ;;  %v666_v58 = vld [vmem:[%s2016_s1 + $0x40] sm:$0xff]  ;;  %v664_v62 = vld [vmem:[%s2016_s1 + $0x30] sm:$0xff] }
 0x1a7   : > { %v1650_v61 = vpop.xlane.xlu0 %506  ;;  %v1662_v1 = vsel %vm525_vm6, %v1610_v49, 128  ;;  %v814_v2 = vsel %vm806_vm7, %v1635_v56, %v1633_v55 }
 0x1a8   : > { %vm523_vm8 = vcmp.le.f32.partialorder %v497_v37, %v1650_v61  ;;  %v1656_v63 = vcvt.s32.f32 %v539_v59  ;;  %vm804_vm9 = vcmp.lt.f32.partialorder %v1650_v61, %v1647_v60  ;;  %823 = vst.msk [vmem:[#allocation2 + $0x18] sm:$0xff] %vm334_vm1, %v814_v2  ;;  %v581_v11 = vshra.s32 %v1662_v1, 16  ;;  %v665_v59 = vld [vmem:[%s2016_s1 + $0x38] sm:$0xff]  ;;  %v663_v2 = vld [vmem:[%s2016_s1 + $0x28] sm:$0xff] }
 0x1a9   : > { %v1659_v0 = vsel %vm523_vm8, %v1610_v49, 128  ;;  %v812_v7 = vsel %vm804_vm9, %v1650_v61, %v1647_v60  ;;  %v580_v41 = vand.u32 65535, %v1662_v1 }
 0x1aa   : > { %542 = vmin.xlane.f32.xlu0 %v1656_v63  ;;  %v553_v4 = vshra.s32 %v1659_v0, 16  ;;  %821 = vst.msk [vmem:[#allocation2 + $0x8] sm:$0xff] %vm334_vm1, %v812_v7  ;;  %v1718_v24 = vcvt.s32.f32 %v581_v11  ;;  %v538_v7 = vand.u32 65535, %v1638_v57 }
 0x1ab   : > { %v1681_v8 = vpop.xlane.xlu0 %512 }
 0x1ac   : > { %vm526_vm10 = vcmp.le.f32.partialorder %v500_v40, %v1681_v8  ;;  %v1687_v10 = vcvt.s32.f32 %v553_v4  ;;  %vm807_vm11 = vcmp.lt.f32.partialorder %v1681_v8, %v1671_v3  ;;  %v662_v4 = vld [vmem:[%s2016_s1 + $0x20] sm:$0xff] }
 0x1ad   : > { %v1693_v12 = vsel %vm526_vm10, %v1610_v49, 128  ;;  %v815_v13 = vsel %vm807_vm11, %v1681_v8, %v1671_v3  ;;  %v840_v60 = vsel %vm807_vm11, 1, %v1414_v45 }
 0x1ae   : > { %570 = vmin.xlane.f32.xlu0 %v1683_v9  ;;  %556 = vmin.xlane.f32.xlu1 %v1687_v10  ;;  %v595_v14 = vshra.s32 %v1693_v12, 16  ;;  %824 = vst.msk [vmem:[#allocation2 + $0x20] sm:$0xff] %vm334_vm1, %v815_v13  ;;  %v540_v13 = vcvt.s32.f32 %v538_v7  ;;  %v594_v57 = vand.u32 65535, %v1693_v12  ;;  %v838_v7 = vsel %vm805_vm3, 1, %v1414_v45 }
 0x1af   : > { %v1708_v17 = vpop.xlane.xlu0 %516  ;;  %v1710_v18 = vpop.xlane.xlu1 %514 }
 0x1b0   : > { %vm528_vm12 = vcmp.le.f32.partialorder %v1597_v43, %v1708_v17  ;;  %vm527_vm13 = vcmp.le.f32.partialorder %v1599_v44, %v1710_v18  ;;  %v1716_v23 = vcvt.s32.f32 %v595_v14  ;;  %vm808_vm14 = vcmp.lt.f32.partialorder %v1710_v18, %v1704_v15  ;;  %v671_v43 = vld [vmem:[%s2016_s1 + $0x68] sm:$0xff]  ;;  %v670_v44 = vld [vmem:[%s2016_s1 + $0x60] sm:$0xff] }
 0x1b1   : > { %v1721_v27 = vsel %vm528_vm12, %v1610_v49, 128  ;;  %v1724_v28 = vsel %vm527_vm13, %v1610_v49, 128  ;;  %vm809_vm15 = vcmp.lt.f32.partialorder %v1708_v17, %v1706_v16  ;;  %v816_v33 = vsel %vm808_vm14, %v1710_v18, %v1704_v15  ;;  %1215 = vmatprep.subr.mxu1 %v671_v43 }
 0x1b2   : > { %598 = vmin.xlane.f32.xlu0 %v1716_v23  ;;  %584 = vmin.xlane.f32.xlu1 %v1718_v24  ;;  %v623_v29 = vshra.s32 %v1721_v27, 16  ;;  %v609_v30 = vshra.s32 %v1724_v28, 16  ;;  %v817_v34 = vsel %vm809_vm15, %v1708_v17, %v1706_v16  ;;  %825 = vst.msk [vmem:[#allocation2 + $0x28] sm:$0xff] %vm334_vm1, %v816_v33  ;;  %v566_v14 = vand.u32 65535, %v1628_v54 }
 0x1b3   : > { %v1736_v32 = vpop.xlane.xlu1 %518  ;;  %826 = vst.msk [vmem:[#allocation2 + $0x30] sm:$0xff] %vm334_vm1, %v817_v34  ;;  %1216 = vmatpush3.msra.mxu1 %v671_v43  ;;  %v596_v43 = vcvt.s32.f32 %v594_v57  ;;  %v622_v12 = vand.u32 65535, %v1721_v27  ;;  %v608_v1 = vand.u32 65535, %v1724_v28  ;;  %v841_v51 = vsel %vm808_vm14, 1, %v1414_v45 }
 0x1b4   : > { %vm529_vm2 = vcmp.le.f32.partialorder %v1605_v46, %v1736_v32  ;;  %v1750_v35 = vcvt.s32.f32 %v623_v29  ;;  %v1752_v36 = vcvt.s32.f32 %v609_v30  ;;  %vm810_vm4 = vcmp.lt.f32.partialorder %v1736_v32, %v1734_v31  ;;  %v669_v46 = vld [vmem:[%s2016_s1 + $0x58] sm:$0xff]  ;;  %1217 = vmatprep.subr.mxu1 %v670_v44 }
 0x1b5   : > { %v1757_v37 = vsel %vm529_vm2, %v1610_v49, 128  ;;  %v818_v39 = vsel %vm810_vm4, %v1736_v32, %v1734_v31  ;;  %1218 = vmatpush3.msra.mxu1 %v670_v44  ;;  %v552_v29 = vand.u32 65535, %v1659_v0  ;;  %v582_v44 = vcvt.s32.f32 %v580_v41 }
 0x1b6   : > { %626 = vmin.xlane.f32.xlu0 %v1750_v35  ;;  %612 = vmin.xlane.f32.xlu1 %v1752_v36  ;;  %v637_v38 = vshra.s32 %v1757_v37, 16  ;;  %827 = vst.msk [vmem:[#allocation2 + $0x38] sm:$0xff] %vm334_vm1, %v818_v39  ;;  %v636_v27 = vand.u32 65535, %v1757_v37  ;;  %v842_v48 = vsel %vm809_vm15, 1, %v1414_v45  ;;  %v843_v50 = vsel %vm810_vm4, 1, %v1414_v45 }
 0x1b7   : > { %1219 = vmatprep.subr.mxu1 %v669_v46  ;;  %v554_v39 = vcvt.s32.f32 %v552_v29 }
 0x1b8   : > { %v1770_v40 = vcvt.s32.f32 %v637_v38  ;;  %1220 = vmatpush3.msra.mxu1 %v669_v46  ;;  %v568_v38 = vcvt.s32.f32 %v566_v14 }
 0x1b9   : > { %1221 = vmatprep.subr.mxu1 %v668_v47 }
 0x1ba   : > { %640 = vmin.xlane.f32.xlu1 %v1770_v40  ;;  %1222 = vmatpush3.msra.mxu1 %v668_v47 }
 0x1bb   : > { %1223 = vmatprep.subr.mxu1 %v667_v53 }
 0x1bc   : > { %1224 = vmatpush3.msra.mxu1 %v667_v53  ;;  %v624_v53 = vcvt.s32.f32 %v622_v12 }
 0x1bd   : > { %1225 = vmatprep.subr.mxu1 %v666_v58 }
 0x1be   : > { %1226 = vmatpush3.msra.mxu1 %v666_v58  ;;  %v610_v58 = vcvt.s32.f32 %v608_v1 }
 0x1bf   : > { %1227 = vmatprep.subr.mxu1 %v665_v59 }
 0x1c0   : > { %1228 = vmatpush3.msra.mxu1 %v665_v59  ;;  %v660_v59 = vld [vmem:[%s2016_s1 + $0x10] sm:$0xff] }
 0x1c1   : > { %1229 = vmatprep.subr.mxu1 %v664_v62 }
 0x1c2   : > { %1230 = vmatpush3.msra.mxu1 %v664_v62  ;;  %v638_v62 = vcvt.s32.f32 %v636_v27 }
 0x1c3   : > { %1231 = vmatprep.subr.mxu1 %v663_v2 }
 0x1c4   : > { %1232 = vmatpush3.msra.mxu1 %v663_v2  ;;  %v658_v2 = vld [vmem:[%s2016_s1] sm:$0xff] }
 0x1c5   : > { %1233 = vmatprep.subr.mxu1 %v662_v4 }
 0x1c6   : > { %1234 = vmatpush3.msra.mxu1 %v662_v4  ;;  %v836_v4 = vsel %vm803_vm5, 1, %v1414_v45 }
 0x233   : > { %v1810_v11 = vpop.xlane.xlu0 %542 }
 0x234   : > { %vm544_vm1 = vcmp.eq.f32.partialorder %v1656_v63, %v1810_v11  ;;  %v549_v52 = vcvt.f32.s32 %v1810_v11  ;;  %v1415_v11 = vmov 1.0  }
 0x235   : > { %v545_v30 = vsel %vm544_vm1, %v540_v13, inf  ;;  %v839_v13 = vsel %vm806_vm7, 1, %v1414_v45 }
 0x236   : > { %546 = vmin.xlane.f32.xlu0 %v545_v30  ;;  %v550_v61 = vshll.u32 %v549_v52, 16  ;;  %v830_v52 = vld [vmem:[#allocation3 + $0x10] sm:$0xff] }
 0x237   : > { %v1816_v33 = vpop.xlane.xlu0 %570  ;;  %v1818_v34 = vpop.xlane.xlu1 %556 }
 0x238   : > { %vm572_vm6 = vcmp.eq.f32.partialorder %v1683_v9, %v1816_v33  ;;  %vm558_vm8 = vcmp.eq.f32.partialorder %v1687_v10, %v1818_v34  ;;  %v577_v55 = vcvt.f32.s32 %v1816_v33  ;;  %v563_v3 = vcvt.f32.s32 %v1818_v34 }
 0x239   : > { %v573_v54 = vsel %vm572_vm6, %v568_v38, inf  ;;  %v559_v63 = vsel %vm558_vm8, %v554_v39, inf }
 0x23a   : > { %574 = vmin.xlane.f32.xlu0 %v573_v54  ;;  %560 = vmin.xlane.f32.xlu1 %v559_v63  ;;  %v578_v18 = vshll.u32 %v577_v55, 16  ;;  %v564_v31 = vshll.u32 %v563_v3, 16 }
 0x23b   : > { %v1826_v0 = vpop.xlane.xlu0 %598  ;;  %v1828_v42 = vpop.xlane.xlu1 %584 }
 0x23c   : > { %vm600_vm10 = vcmp.eq.f32.partialorder %v1716_v23, %v1826_v0  ;;  %vm586_vm12 = vcmp.eq.f32.partialorder %v1718_v24, %v1828_v42  ;;  %v661_v23 = vld [vmem:[%s2016_s1 + $0x18] sm:$0xff]  ;;  %v605_v16 = vcvt.f32.s32 %v1826_v0  ;;  %v591_v17 = vcvt.f32.s32 %v1828_v42 }
 0x23d   : > { %v601_v9 = vsel %vm600_vm10, %v596_v43, inf  ;;  %v587_v10 = vsel %vm586_vm12, %v582_v44, inf  ;;  %1235 = vmatprep.subr.mxu1 %v661_v23 }
 0x23e   : > { %602 = vmin.xlane.f32.xlu0 %v601_v9  ;;  %588 = vmin.xlane.f32.xlu1 %v587_v10  ;;  %v606_v38 = vshll.u32 %v605_v16, 16  ;;  %v592_v34 = vshll.u32 %v591_v17, 16 }
 0x23f   : > { %v1836_v46 = vpop.xlane.xlu0 %626  ;;  %v1838_v47 = vpop.xlane.xlu1 %612  ;;  %1236 = vmatpush3.msra.mxu1 %v661_v23 }
 0x240   : > { %vm628_vm13 = vcmp.eq.f32.partialorder %v1750_v35, %v1836_v46  ;;  %vm614_vm2 = vcmp.eq.f32.partialorder %v1752_v36, %v1838_v47  ;;  %1237 = vmatprep.subr.mxu1 %v660_v59  ;;  %v659_v36 = vld [vmem:[%s2016_s1 + $0x8] sm:$0xff]  ;;  %v633_v39 = vcvt.f32.s32 %v1836_v46  ;;  %v619_v57 = vcvt.f32.s32 %v1838_v47 }
 0x241   : > { %v629_v24 = vsel %vm628_vm13, %v624_v53, inf  ;;  %v615_v28 = vsel %vm614_vm2, %v610_v58, inf  ;;  %1238 = vmatpush3.msra.mxu1 %v660_v59 }
 0x242   : > { %630 = vmin.xlane.f32.xlu0 %v629_v24  ;;  %616 = vmin.xlane.f32.xlu1 %v615_v28  ;;  %v634_v44 = vshll.u32 %v633_v39, 16  ;;  %v620_v12 = vshll.u32 %v619_v57, 16 }
 0x243   : > { %v1851_v37 = vpop.xlane.xlu1 %640  ;;  %1239 = vmatprep.subr.mxu1 %v659_v36 }
 0x244   : > { %vm642_vm1 = vcmp.eq.f32.partialorder %v1770_v40, %v1851_v37  ;;  %1240 = vmatpush3.msra.mxu1 %v659_v36  ;;  %v837_v40 = vsel %vm804_vm9, 1, %v1414_v45  ;;  %v647_v1 = vcvt.f32.s32 %v1851_v37 }
 0x245   : > { %v643_v35 = vsel %vm642_vm1, %v638_v62, inf  ;;  %1241 = vmatprep.subr.mxu1 %v658_v2 }
 0x246   : > { %644 = vmin.xlane.f32.xlu1 %v643_v35  ;;  %1242 = vmatpush3.msra.mxu1 %v658_v2  ;;  %v648_v23 = vshll.u32 %v647_v1, 16  ;;  %v829_v2 = vld [vmem:[#allocation3 + $0x8] sm:$0xff] }
 0x257   : > { %848 = vperm.xlu1 %1326, %v837_v40  }
 0x258   : > { %845 = vperm.xlu0 %1325, %v836_v4  }
 0x25b   : > { %851 = vperm.xlu1 %1326, %v838_v7   ;;  %v828_v7 = vld [vmem:[#allocation3] sm:$0xff] }
 0x25f   : > { %854 = vperm.xlu1 %1326, %v839_v13  }
 0x263   : > { %857 = vperm.xlu1 %1326, %v840_v60  }
 0x267   : > { %860 = vperm.xlu1 %1326, %v841_v51   ;;  %v831_v51 = vld [vmem:[#allocation3 + $0x18] sm:$0xff] }
 0x26b   : > { %863 = vperm.xlu1 %1326, %v842_v48  }
 0x26f   : > { %866 = vperm.xlu1 %1326, %v843_v50  }
 0x2bf   : > { %v547_v56 = vpop.xlane.xlu0 %546 }
 0x2c0   : > { %v548_v8 = vcvt.f32.s32 %v547_v56 }
 0x2c2   : > { %v551_v15 = vadd.s32 %v550_v61, %v548_v8  ;;  %v833_v61 = vld [vmem:[#allocation3 + $0x28] sm:$0xff] }
 0x2c3   : > { %v575_v14 = vpop.xlane.xlu0 %574  ;;  %v561_v29 = vpop.xlane.xlu1 %560 }
 0x2c4   : > { %v576_v45 = vcvt.f32.s32 %v575_v14  ;;  %v562_v32 = vcvt.f32.s32 %v561_v29  ;;  %vm650_vm3 = vcmp.eq.s32.totalorder %v1610_v49, %v551_v15  ;;  %v832_v15 = vld [vmem:[#allocation3 + $0x20] sm:$0xff]  ;;  %v835_v29 = vld [vmem:[#allocation3 + $0x38] sm:$0xff] }
 0x2c5   : > { %1243 = vmatprep.mubr.msk.f32.mxu1 %vm650_vm3, %v1415_v11 }
 0x2c6   : > { %v579_v30 = vadd.s32 %v578_v18, %v576_v45  ;;  %v565_v33 = vadd.s32 %v564_v31, %v562_v32 }
 0x2c7   : > { %v603_v41 = vpop.xlane.xlu0 %602  ;;  %v589_v54 = vpop.xlane.xlu1 %588 }
 0x2c8   : > { %v604_v63 = vcvt.f32.s32 %v603_v41  ;;  %v590_v0 = vcvt.f32.s32 %v589_v54  ;;  %vm651_vm5 = vcmp.eq.s32.totalorder %v1610_v49, %v565_v33  ;;  %vm652_vm7 = vcmp.eq.s32.totalorder %v1610_v49, %v579_v30  ;;  %v834_v30 = vld [vmem:[#allocation3 + $0x30] sm:$0xff] }
 0x2c9   : > { %1244 = vmatmul.mubr.msk.f32.vlgmr.msra.gmra.mxu1 %vm651_vm5, %v1415_v11 }
 0x2ca   : > { %v607_v42 = vadd.s32 %v606_v38, %v604_v63  ;;  %v593_v43 = vadd.s32 %v592_v34, %v590_v0  ;;  %1246 = vmatprep.mubr.msk.f32.mxu1 %vm652_vm7, %v1415_v11 }
 0x2cb   : > { %v631_v9 = vpop.xlane.xlu0 %630  ;;  %v617_v10 = vpop.xlane.xlu1 %616 }
 0x2cc   : > { %v632_v46 = vcvt.f32.s32 %v631_v9  ;;  %v618_v47 = vcvt.f32.s32 %v617_v10  ;;  %vm653_vm9 = vcmp.eq.s32.totalorder %v1610_v49, %v593_v43  ;;  %vm654_vm11 = vcmp.eq.s32.totalorder %v1610_v49, %v607_v42 }
 0x2cd   : > { %1247 = vmatmul.mubr.msk.f32.gmra.mxu1 %vm653_vm9, %v1415_v11 }
 0x2ce   : > { %v635_v53 = vadd.s32 %v634_v44, %v632_v46  ;;  %v621_v58 = vadd.s32 %v620_v12, %v618_v47  ;;  %1249 = vmatprep.mubr.msk.f32.mxu1 %vm654_vm11, %v1415_v11 }
 0x2cf   : > { %v645_v27 = vpop.xlane.xlu1 %644 }
 0x2d0   : > { %v646_v24 = vcvt.f32.s32 %v645_v27  ;;  %vm655_vm14 = vcmp.eq.s32.totalorder %v1610_v49, %v621_v58  ;;  %vm656_vm15 = vcmp.eq.s32.totalorder %v1610_v49, %v635_v53 }
 0x2d1   : > { %1250 = vmatmul.mubr.msk.f32.gmra.mxu1 %vm655_vm14, %v1415_v11 }
 0x2d2   : > { %v649_v28 = vadd.s32 %v648_v23, %v646_v24  ;;  %1252 = vmatprep.mubr.msk.f32.mxu1 %vm656_vm15, %v1415_v11 }
 0x2d3   : > { %v849_v59 = vpop.permute.xlu1 %848  ;;  %v846_v40 = vpop.permute.xlu0 %845 }
 0x2d4   : > { %vm657_vm4 = vcmp.eq.s32.totalorder %v1610_v49, %v649_v28  ;;  %vm869_vm6 = vcmp.eq.s32.totalorder %v849_v59, 1  ;;  %vm868_vm8 = vcmp.eq.s32.totalorder %v846_v40, 1 }
 0x2d5   : > { %1253 = vmatmul.mubr.msk.f32.gmra.mxu1 %vm657_vm4, %v1415_v11 }
 0x2d7   : > { %v852_v37 = vpop.permute.xlu1 %851 }
 0x2d8   : > { %vm870_vm12 = vcmp.eq.s32.totalorder %v852_v37, 1 }
 0x2db   : > { %v855_v62 = vpop.permute.xlu1 %854 }
 0x2dc   : > { %vm871_vm10 = vcmp.eq.s32.totalorder %v855_v62, 1 }
 0x2df   : > { %v858_v35 = vpop.permute.xlu1 %857 }
 0x2e0   : > { %vm872_vm2 = vcmp.eq.s32.totalorder %v858_v35, 1 }
 0x2e3   : > { %v861_v36 = vpop.permute.xlu1 %860 }
 0x2e4   : > { %vm873_vm13 = vcmp.eq.s32.totalorder %v861_v36, 1 }
 0x2e7   : > { %v864_v49 = vpop.permute.xlu1 %863 }
 0x2e8   : > { %vm874_vm3 = vcmp.eq.s32.totalorder %v864_v49, 1 }
 0x2eb   : > { %v867_v18 = vpop.permute.xlu1 %866 }
 0x2ec   : > { %vm875_vm1 = vcmp.eq.s32.totalorder %v867_v18, 1 }
 0x389   : > { %v1245_v4 = vpop.f32.mrf.mxu1 }
 0x38a   : > { %v877_v13 = vsel %vm869_vm6, %v1245_v4, %v829_v2 }
 0x38b   : > { %885 = vst.msk [vmem:[#allocation3 + $0x8] sm:$0xff] %vm387_vm0, %v877_v13  ;;  %v756_v60 = vpop.f32.mrf.mxu1 }
 0x38c   : > { %v876_v48 = vsel %vm868_vm8, %v756_v60, %v828_v7 }
 0x38d   : > { %884 = vst.msk [vmem:[#allocation3] sm:$0xff] %vm387_vm0, %v876_v48  ;;  %v1248_v50 = vpop.f32.mrf.mxu1 }
 0x38e   : > { %v879_v55 = vsel %vm871_vm10, %v1248_v50, %v831_v51 }
 0x38f   : > { %887 = vst.msk [vmem:[#allocation3 + $0x18] sm:$0xff] %vm387_vm0, %v879_v55  ;;  %v766_v56 = vpop.f32.mrf.mxu1 }
 0x390   : > { %v878_v3 = vsel %vm870_vm12, %v766_v56, %v830_v52 }
 0x391   : > { %886 = vst.msk [vmem:[#allocation3 + $0x10] sm:$0xff] %vm387_vm0, %v878_v3  ;;  %v1251_v8 = vpop.f32.mrf.mxu1 }
 0x392   : > { %v881_v16 = vsel %vm873_vm13, %v1251_v8, %v833_v61  ;;  %v896_v17 = vld [vmem:[#allocation3 + $0x8] sm:$0xff] }
 0x393   : > { %889 = vst.msk [vmem:[#allocation3 + $0x28] sm:$0xff] %vm387_vm0, %v881_v16  ;;  %v776_v14 = vpop.f32.mrf.mxu1  ;;  %v912_v31 = vsub.f32 %v1528_v6, %v896_v17  ;;  %904 = vst.msk [vmem:[%s1918_s25 + $0x8] sm:$0xff] %vm387_vm0, %v896_v17 }
 0x394   : > { %v880_v45 = vsel %vm872_vm2, %v776_v14, %v832_v15  ;;  %v895_v32 = vld [vmem:[#allocation3] sm:$0xff] }
 0x395   : > { %888 = vst.msk [vmem:[#allocation3 + $0x20] sm:$0xff] %vm387_vm0, %v880_v45  ;;  %v1254_v11 = vpop.f32.mrf.mxu1  ;;  %v911_v33 = vsub.f32 %v1525_v5, %v895_v32  ;;  %903 = vst.msk [vmem:[%s1918_s25] sm:$0xff] %vm387_vm0, %v895_v32  ;;  %v920_v41 = vmul.f32 %v912_v31, %v912_v31 }
 0x396   : > { %v883_v6 = vsel %vm875_vm1, %v1254_v11, %v835_v29  ;;  %v898_v38 = vld [vmem:[#allocation3 + $0x18] sm:$0xff] }
 0x397   : > { %891 = vst.msk [vmem:[#allocation3 + $0x38] sm:$0xff] %vm387_vm0, %v883_v6  ;;  %v786_v34 = vpop.f32.mrf.mxu1  ;;  %v914_v39 = vsub.f32 %v1563_v20, %v898_v38  ;;  %v919_v57 = vmul.f32 %v911_v33, %v911_v33  ;;  %906 = vst.msk [vmem:[%s1918_s25 + $0x18] sm:$0xff] %vm387_vm0, %v898_v38  ;;  %v928_v12 = vsel %vm387_vm0, %v920_v41, 0.0 }
 0x398   : > { %v882_v54 = vsel %vm874_vm3, %v786_v34, %v834_v30  ;;  %v897_v63 = vld [vmem:[#allocation3 + $0x10] sm:$0xff] }
 0x399   : > { %890 = vst.msk [vmem:[#allocation3 + $0x30] sm:$0xff] %vm387_vm0, %v882_v54  ;;  %v913_v5 = vsub.f32 %v1560_v19, %v897_v63  ;;  %v927_v0 = vsel %vm387_vm0, %v919_v57, 0.0  ;;  %905 = vst.msk [vmem:[%s1918_s25 + $0x10] sm:$0xff] %vm387_vm0, %v897_v63  ;;  %v922_v44 = vmul.f32 %v914_v39, %v914_v39 }
 0x39a   : > { %v900_v42 = vld [vmem:[#allocation3 + $0x28] sm:$0xff]  ;;  %v929_v9 = vadd.f32 %v928_v12, %v927_v0 }
 0x39b   : > { %v916_v43 = vsub.f32 %v1569_v22, %v900_v42  ;;  %v921_v20 = vmul.f32 %v913_v5, %v913_v5  ;;  %908 = vst.msk [vmem:[%s1918_s25 + $0x28] sm:$0xff] %vm387_vm0, %v900_v42  ;;  %v932_v27 = vsel %vm387_vm0, %v922_v44, 0.0 }
 0x39c   : > { %v899_v1 = vld [vmem:[#allocation3 + $0x20] sm:$0xff] }
 0x39d   : > { %v915_v10 = vsub.f32 %v1566_v21, %v899_v1  ;;  %v930_v19 = vsel %vm387_vm0, %v921_v20, 0.0  ;;  %907 = vst.msk [vmem:[%s1918_s25 + $0x20] sm:$0xff] %vm387_vm0, %v899_v1  ;;  %v924_v58 = vmul.f32 %v916_v43, %v916_v43 }
 0x39e   : > { %v902_v46 = vld [vmem:[#allocation3 + $0x38] sm:$0xff]  ;;  %v931_v47 = vadd.f32 %v930_v19, %v929_v9 }
 0x39f   : > { %v918_v22 = vsub.f32 %v1581_v26, %v902_v46  ;;  %v923_v53 = vmul.f32 %v915_v10, %v915_v10  ;;  %910 = vst.msk [vmem:[%s1918_s25 + $0x38] sm:$0xff] %vm387_vm0, %v902_v46  ;;  %v936_v62 = vsel %vm387_vm0, %v924_v58, 0.0 }
 0x3a0   : > { %v901_v23 = vld [vmem:[#allocation3 + $0x30] sm:$0xff]  ;;  %v933_v24 = vadd.f32 %v932_v27, %v931_v47 }
 0x3a1   : > { %v917_v21 = vsub.f32 %v1578_v25, %v901_v23  ;;  %v934_v28 = vsel %vm387_vm0, %v923_v53, 0.0  ;;  %909 = vst.msk [vmem:[%s1918_s25 + $0x30] sm:$0xff] %vm387_vm0, %v901_v23  ;;  %v926_v26 = vmul.f32 %v918_v22, %v918_v22 }
 0x3a2   : > { %v935_v59 = vadd.f32 %v934_v28, %v933_v24 }
 0x3a3   : > { %v925_v37 = vmul.f32 %v917_v21, %v917_v21  ;;  %v940_v40 = vsel %vm387_vm0, %v926_v26, 0.0 }
 0x3a4   : > { %v937_v35 = vadd.f32 %v936_v62, %v935_v59 }
 0x3a5   : > { %v938_v36 = vsel %vm387_vm0, %v925_v37, 0.0 }
 0x3a6   : > { %v939_v2 = vadd.f32 %v938_v36, %v937_v35 }
 0x3a8   : > { %v941_v4 = vadd.f32 %v940_v40, %v939_v2 }
 0x3aa   : > { %942 = vadd.xlane.f32.xlu1 %v941_v4 }
 0x3ab   : > { %1348 = shalt.err (!%p1345_p5)
}
 0x3ac   : > { %s1349_s15 = scalar_lea.hbm %s1959_s9, 1024  ;;  %s1353_s24 = scalar_lea.hbm %s2019_s4, 2048 }
 0x3ad   : > { %p1350_p6 = scmp.ne.s32.totalorder %s1959_s9, %s1349_s15  ;;  %p1354_p10 = scmp.lt.s32.totalorder %s1959_s9, %s2019_s4 }
 0x3ae   : > { %p1355_p11 = scmp.lt.s32.totalorder %s1353_s24, %s1349_s15 }
 0x3af   : > { %p1351_p7 = pnand %p1350_p6, %p1489_p4 }
 0x3b0   : > { %p1356_p12 = por %p1355_p11, %p1354_p10 }
 0x3b1   : > { %p1352_p9 = pneg %p1351_p7 }
 0x3b3   : > { %p1357_p13 = pnand %p1356_p12, %p1352_p9 }
 0x3b5   : > { %1360 = shalt.err (!%p1357_p13)
}
 0x3b6   : > { %s1417_s7 = smov 128   ;;  %s1418_s8 = smov 8   ;;  %vm952_vm0 = vcmask 0  }
 0x3b7   : > { %1265 = dma.vmem_to_hbm [thread:$0]  (%p1489_p4), %s1961_s29, 1024, %s1959_s9, %s1965_s10, %s1417_s7, %s1417_s7, %s1418_s8  }
 0x3b8   : > { %p302_p0 = scmp.lt.s32.totalorder %s1403_s21, 1 }
 0x3ba   : > { %s2033_s21 = smov (!%p302_p0, %s1403_s21), 1 }
 0x3bb   : > { %s304_s13 = scalar_lea.vmem %s2020_s5, %s2033_s21 }
 0x433   : > { %v943_v25 = vpop.xlane.xlu1 %942 }
 0x434   : > { %v944_v7 = vrot.slane %v943_v25, 4 }
 0x436   : > { %v945_v13 = vadd.f32 %v944_v7, %v943_v25 }
 0x438   : > { %v946_v60 = vrot.slane %v945_v13, 2 }
 0x43a   : > { %v947_v51 = vadd.f32 %v946_v60, %v945_v13 }
 0x43c   : > { %v948_v49 = vrot.slane %v947_v51, 1 }
 0x43e   : > { %v949_v48 = vadd.f32 %v948_v49, %v947_v51 }
 0x440   : > { %1263 = vpush %v949_v48 }
 0x471   : > { %s1264_s14 = spop %1263 }
 0x472   : > { %v951_v50 = vstv %s1264_s14 }
 0x473   : > { %953 = vst.msk [vmem:[%s304_s13] sm:$0x1] %vm952_vm0, %v951_v50 }
 0x474 PF: > { %p1271_p4 = scmp.ge.s32.totalorder %s1411_s23, 2  ;;  %s989_s28 = sand.u32 1, %s1391_s18  }
 0x475   : > { %s990_s29 = scalar_lea.sflag [#allocation5], %s989_s28 }
 0x476   : > { %p1268_p1 = pnand %p1271_p4, %p1496_p8 }
 0x478   : > { %p1269_p2 = pneg %p1268_p1 }
 0x47a   : > { %1386 = dma.done.wait (%p1269_p2), %s990_s29, 1024  }
 0x47b   : > { %1388 = vsyncadd (%p1269_p2), %s990_s29, 4294966272  ;;  %s19_s23 = sadd.s32 1, %s1411_s23   ;;  %s2023_s18 = smov %s1395_s19 }
 0x47c   : > { %p16_p3 = scmp.ge.s32.totalorder %s19_s23, 4   ;;  %s2024_s19 = smov %s1399_s20 }
 0x47d   : > { %s2025_s20 = smov %s1502_s6  ;;  %s2026_s21 = smov %s1407_s22 }
 0x47e   : > { %s2027_s22 = smov %s2029_s26  ;;  %18 = sbr.rel (!%p16_p3) target bundleno = 4 (0x4), region = 100 }
 0x483   :  { %1001 = vsyncpa [#allocation5], 1 }
 0x484   :  { %1003 = vsyncpa [#allocation5 + $0x1], 1 }

// kernel: vector_quantizer_forward.1
= control target key start
LH: loop header
LB: loop body
LE: loop exit
PB: predicated region body
PF: predicated region fallthrough
CT: control target
= control target key end

     0   :  { %11 = vsyncpa [#allocation5], 0  ;;  %s2015_s0 = inlined_call_operand.vmem [shape: bf16[128,32], index: 0, kind: input, shape index: {}]   ;;  %s2016_s1 = inlined_call_operand.vmem [shape: f32[128,32], index: 1, kind: input, shape index: {}]   ;;  %s2017_s2 = inlined_call_operand.vmem [shape: f32[1,128], index: 2, kind: input, shape index: {}]   ;;  %s2018_s3 = inlined_call_operand.vmem [shape: f32[128,32], index: 3, kind: input, shape index: {}]   ;;  %s2019_s4 = inlined_call_operand.hbm [shape: f32[128,32], index: 4, kind: output, shape index: {0}]   ;;  %s2020_s5 = inlined_call_operand.vmem [shape: f32[2,1,1], index: 5, kind: output, shape index: {1}]  }
   0x1   :  { %13 = vsyncpa [#allocation5 + $0x1], 0  ;;  %s1449_s18 = smov 0   ;;  %s1451_s19 = smov 0  }
   0x2   :  { %s1453_s20 = smov 0   ;;  %s1455_s21 = smov 0  }
   0x3   :  { %s1457_s22 = smov 0   ;;  %s1459_s23 = smov 0  }
   0x4 LB: > { %s1105_s24 = sadd.s32 4294967295, %s1411_s23   ;;  %s1106_s25 = sadd.s32 4294967294, %s1411_s23   ;;  %s1411_s23 = sphi %s1459_s23, %s19_s23   ;;  %s1407_s22 = sphi %s1457_s22, %s2027_s22   ;;  %s1403_s21 = sphi %s1455_s21, %s2026_s21   ;;  %s1399_s20 = sphi %s1453_s20, %s2025_s20   ;;  %s1395_s19 = sphi %s1451_s19, %s2024_s19   ;;  %s1391_s18 = sphi %s1449_s18, %s2023_s18  }
   0x5   : > { %s31_s26 = sadd.s32 1, %s1407_s22  ;;  %s142_s27 = sadd.s32 1, %s1399_s20 }
   0x6   : > { %p33_p0 = scmp.ge.s32.totalorder %s31_s26, 2  ;;  %p152_p1 = scmp.ne.s32.totalorder %s1399_s20, %s1395_s19 }
   0x7   : > { %p153_p2 = scmp.eq.s32.totalorder %s1105_s24, 1  ;;  %p158_p3 = scmp.ne.s32.totalorder %s1395_s19, %s1391_s18 }
   0x8   : > { %s2029_s26 = smov (%p33_p0, %s31_s26), 0  ;;  %p159_p5 = scmp.eq.s32.totalorder %s1106_s25, 1 }
   0x9   : > { %p1489_p4 = por %p153_p2, %p152_p1  ;;  %s139_s29 = ssub.s32 %s1407_s22, %s2029_s26 }
   0xa   : > { %p1112_p6 = scmp.ge.s32.totalorder %s1411_s23, 1  ;;  %p140_p7 = scmp.eq.s32.totalorder %s139_s29, 0 }
   0xb   : > { %p1496_p8 = por %p159_p5, %p158_p3  ;;  %p236_p9 = scmp.lt.s32.totalorder %s1411_s23, 3 }
   0xc   : > { %s1502_s6 = scalar_select %p140_p7, %s1399_s20, %s142_s27  }
   0xd   : > { %p237_p10 = pnand %p1112_p6, %p236_p9 }
   0xe   : > { %s1114_s11 = sshll.u32 (!%p237_p10), %s1403_s21, 3  ;;  %s1150_s27 = sshll.u32 (!%p237_p10), %s1403_s21, 10 }
   0xf   : > { %240 = sbr.rel (%p237_p10) target bundleno = 1140 (0x474), region = 36  ;;  %p296_p11 = scmp.lt.s32.totalorder (!%p237_p10), %s1114_s11, 15 }
  0x10   : > { %s1959_s9 = scalar_lea.hbm (!%p237_p10), %s2019_s4, %s1150_s27  ;;  %s1416_s12 = smov (!%p237_p10), [#allocation4]  }
  0x11   : > { %s1339_s13 = sshll.u32 (!%p237_p10), %s1416_s12, 4  ;;  %s1340_s13 = int_to_ptr.vmem [resolvable:$false] %s1339_s13 }
  0x14   : > { %v1327_v0 = vld [vmem:[%s2015_s0 + $0x38] sm:$0xff]   ;;  %vm387_vm0 = vcmask 261120   ;;  %v1328_v1 = vld [vmem:[%s2015_s0 + $0x30] sm:$0xff]   ;;  %v1329_v4 = vld [vmem:[%s2015_s0 + $0x28] sm:$0xff]   ;;  %s2031_s11 = smov (!%p296_p11, %s1114_s11), 15  ;;  %vm334_vm1 = vcmask 7168   ;;  %v520_v47 = vlaneseq }
  0x15   : > { %1255 = vmatprep.subr.msk.bf16.mxu0 %vm387_vm0, %v1327_v0  ;;  %v422_v2 = vsel %vm387_vm0, %v1327_v0, 0  ;;  %v419_v3 = vsel %vm387_vm0, %v1328_v1, 0  ;;  %s1115_s14 = sshll.u32 %s2031_s11, 3  ;;  %v416_v8 = vsel %vm387_vm0, %v1329_v4, 0  ;;  %v1330_v9 = vld [vmem:[%s2015_s0 + $0x20] sm:$0xff]   ;;  %v1331_v11 = vld [vmem:[%s2015_s0 + $0x18] sm:$0xff]  }
  0x16   : > { %1188 = vmatpush3.bf16.xpose.msra.mxu0 %v422_v2  ;;  %s1522_s17 = scalar_lea.vmem %s2018_s3, %s1115_s14  ;;  %v413_v10 = vsel %vm387_vm0, %v1330_v9, 0  ;;  %v410_v12 = vsel %vm387_vm0, %v1331_v11, 0  ;;  %v1332_v13 = vld [vmem:[%s2015_s0 + $0x10] sm:$0xff]   ;;  %v1333_v15 = vld [vmem:[%s2015_s0 + $0x8] sm:$0xff]   ;;  %v1334_v17 = vld [vmem:[%s2015_s0] sm:$0xff]   ;;  %v1413_v36 = vmov inf  }
  0x17   : > { %1256 = vmatprep.subr.msk.bf16.mxu0 %vm387_vm0, %v1328_v1  ;;  %v1525_v5 = vld [vmem:[%s1522_s17] sm:$0xff]  ;;  %v1528_v6 = vld [vmem:[%s1522_s17 + $0x8] sm:$0xff]  ;;  %v407_v14 = vsel %vm387_vm0, %v1332_v13, 0  ;;  %v404_v16 = vsel %vm387_vm0, %v1333_v15, 0  ;;  %v401_v18 = vsel %vm387_vm0, %v1334_v17, 0  ;;  %v1560_v19 = vld [vmem:[%s1522_s17 + $0x10] sm:$0xff] }
  0x18   : > { %v343_v7 = vpack.c.bf16 %v1528_v6, %v1525_v5  ;;  %v1563_v20 = vld [vmem:[%s1522_s17 + $0x18] sm:$0xff]  ;;  %v1566_v21 = vld [vmem:[%s1522_s17 + $0x20] sm:$0xff]  ;;  %v1569_v22 = vld [vmem:[%s1522_s17 + $0x28] sm:$0xff]  ;;  %336 = vst.msk [vmem:[#allocation2 + $0x8] sm:$0xff] %vm334_vm1, %v1413_v36  ;;  %v1414_v45 = vmov 0   ;;  %v1610_v49 = vand.u32 127, %v520_v47 }
  0x19   : > { %v344_v23 = vpack.c.bf16 %v1563_v20, %v1560_v19  ;;  %v345_v24 = vpack.c.bf16 %v1569_v22, %v1566_v21  ;;  %v1578_v25 = vld [vmem:[%s1522_s17 + $0x30] sm:$0xff]  ;;  %v1581_v26 = vld [vmem:[%s1522_s17 + $0x38] sm:$0xff]  ;;  %v1128_v28 = vld [vmem:[%s2017_s2] ss:$0 sm:$0xff]  ;;  %335 = vst.msk [vmem:[#allocation2] sm:$0xff] %vm334_vm1, %v1413_v36  ;;  %1326 = vset.pattern.permute.xlu1 %v1414_v45  ;;  %1325 = vset.pattern.permute.xlu0 %v1414_v45  ;;  %s272_s17 = sand.u32 1, %s1395_s19  }
  0x1a   : > { %1203 = vmatprep.mubr.msk.bf16.mxu0 %vm387_vm0, %v343_v7  ;;  %v346_v27 = vpack.c.bf16 %v1581_v26, %v1578_v25  ;;  %337 = vst.msk [vmem:[#allocation2 + $0x10] sm:$0xff] %vm334_vm1, %v1413_v36  ;;  %338 = vst.msk [vmem:[#allocation2 + $0x18] sm:$0xff] %vm334_vm1, %v1413_v36  ;;  %v668_v47 = vld [vmem:[%s2016_s1 + $0x50] sm:$0xff]  ;;  %s1113_s24 = sshll.u32 %s272_s17, 6  ;;  %s1965_s10 = scalar_lea.sflag [#allocation5], %s272_s17 }
  0x1b   : > { %339 = vst.msk [vmem:[#allocation2 + $0x20] sm:$0xff] %vm334_vm1, %v1413_v36  ;;  %340 = vst.msk [vmem:[#allocation2 + $0x28] sm:$0xff] %vm334_vm1, %v1413_v36  ;;  %s1918_s25 = scalar_lea.vmem [#allocation4], %s1113_s24  ;;  %s1341_s14 = scalar_lea.vmem %s1340_s13, 2048 }
  0x1c   : > { %341 = vst.msk [vmem:[#allocation2 + $0x30] sm:$0xff] %vm334_vm1, %v1413_v36  ;;  %342 = vst.msk [vmem:[#allocation2 + $0x38] sm:$0xff] %vm334_vm1, %v1413_v36  ;;  %s971_s29 = sshll.u32 %s1918_s25, 4  ;;  %s1961_s29 = int_to_ptr.vmem [resolvable:$true] %s971_s29 }
  0x1d   : > { %s1335_s11 = scalar_lea.vmem %s1961_s29, 1024  ;;  %p1342_p1 = scmp.lt.s32.totalorder %s1961_s29, %s1340_s13 }
  0x1e   : > { %1190 = vmatpush3.bf16.xpose.msra.mxu0 %v419_v3  ;;  %p1336_p12 = scmp.ne.s32.totalorder %s1961_s29, %s1335_s11  ;;  %p1343_p2 = scmp.lt.s32.totalorder %s1341_s14, %s1335_s11 }
  0x1f   : > { %1257 = vmatprep.subr.msk.bf16.mxu0 %vm387_vm0, %v1329_v4  ;;  %v1647_v60 = vld [vmem:[#allocation2 + $0x8] sm:$0xff] }
  0x20   : > { %v1614_v51 = vld [vmem:[#allocation2] sm:$0xff]  ;;  %p1337_p13 = pnand %p1336_p12, %p1489_p4  ;;  %p1344_p3 = por %p1343_p2, %p1342_p1 }
  0x21   : > { %v1608_v48 = vld [vmem:[#allocation2 + $0x10] sm:$0xff]  ;;  %v1633_v55 = vld [vmem:[#allocation2 + $0x18] sm:$0xff] }
  0x22   : > { %v1671_v3 = vld [vmem:[#allocation2 + $0x20] sm:$0xff]  ;;  %p1338_p0 = pneg %p1337_p13 }
  0x24   : > { %p1345_p5 = pnand %p1344_p3, %p1338_p0 }
  0x26   : > { %1192 = vmatpush3.bf16.xpose.msra.mxu0 %v416_v8 }
  0x27   : > { %1258 = vmatprep.subr.msk.bf16.mxu0 %vm387_vm0, %v1330_v9 }
  0x2e   : > { %1194 = vmatpush3.bf16.xpose.msra.mxu0 %v413_v10 }
  0x2f   : > { %1259 = vmatprep.subr.msk.bf16.mxu0 %vm387_vm0, %v1331_v11 }
  0x36   : > { %1196 = vmatpush3.bf16.xpose.msra.mxu0 %v410_v12 }
  0x37   : > { %1260 = vmatprep.subr.msk.bf16.mxu0 %vm387_vm0, %v1332_v13 }
  0x3e   : > { %1198 = vmatpush3.bf16.xpose.msra.mxu0 %v407_v14 }
  0x3f   : > { %1261 = vmatprep.subr.msk.bf16.mxu0 %vm387_vm0, %v1333_v15  ;;  %v1704_v15 = vld [vmem:[#allocation2 + $0x28] sm:$0xff] }
  0x46   : > { %1200 = vmatpush3.bf16.xpose.msra.mxu0 %v404_v16  ;;  %v1706_v16 = vld [vmem:[#allocation2 + $0x30] sm:$0xff] }
  0x47   : > { %1262 = vmatprep.subr.msk.bf16.mxu0 %vm387_vm0, %v1334_v17 }
  0x4e   : > { %1202 = vmatpush3.bf16.xpose.msra.mxu0 %v401_v18 }
  0x55   : > { %1204 = vmatmul.mubr.msk.bf16.vlgmr.msra.gmra.mxu0 %vm387_vm0, %v344_v23 }
  0x56   : > { %1207 = vmatprep.mubr.msk.bf16.mxu0 %vm387_vm0, %v345_v24 }
  0x5d   : > { %1208 = vmatmul.mubr.msk.bf16.gmra.mxu0 %vm387_vm0, %v346_v27 }
 0x115   : > { %v1205_v29 = vpop.f32.mrf.mxu0 }
 0x116   : > { %v498_v30 = vsub.f32 %v1128_v28, %v1205_v29 }
 0x117   : > { %v458_v31 = vpop.f32.mrf.mxu0 }
 0x118   : > { %v496_v32 = vsub.f32 %v1128_v28, %v458_v31  ;;  %508 = vmin.xlane.f32.xlu1 %v498_v30  ;;  %v1734_v31 = vld [vmem:[#allocation2 + $0x38] sm:$0xff] }
 0x119   : > { %v1206_v33 = vpop.f32.mrf.mxu0 }
 0x11a   : > { %v499_v34 = vsub.f32 %v1128_v28, %v1206_v33  ;;  %504 = vmin.xlane.f32.xlu0 %v496_v32 }
 0x11b   : > { %v461_v35 = vpop.f32.mrf.mxu0 }
 0x11c   : > { %v497_v37 = vsub.f32 %v1128_v28, %v461_v35  ;;  %510 = vmin.xlane.f32.xlu1 %v499_v34 }
 0x11d   : > { %v1209_v38 = vpop.f32.mrf.mxu0 }
 0x11e   : > { %506 = vmin.xlane.f32.xlu0 %v497_v37  ;;  %v1597_v43 = vsub.f32 %v1128_v28, %v1209_v38 }
 0x11f   : > { %v474_v39 = vpop.f32.mrf.mxu0 }
 0x120   : > { %v500_v40 = vsub.f32 %v1128_v28, %v474_v39 }
 0x121   : > { %v1210_v41 = vpop.f32.mrf.mxu0 }
 0x122   : > { %512 = vmin.xlane.f32.xlu0 %v500_v40  ;;  %v1605_v46 = vsub.f32 %v1128_v28, %v1210_v41  ;;  %v673_v41 = vld [vmem:[%s2016_s1 + $0x78] sm:$0xff] }
 0x123   : > { %v477_v42 = vpop.f32.mrf.mxu0  ;;  %1211 = vmatprep.subr.mxu1 %v673_v41 }
 0x124   : > { %v1599_v44 = vsub.f32 %v1128_v28, %v477_v42  ;;  %v672_v42 = vld [vmem:[%s2016_s1 + $0x70] sm:$0xff]  ;;  %1212 = vmatpush3.msra.mxu1 %v673_v41 }
 0x125   : > { %1213 = vmatprep.subr.mxu1 %v672_v42 }
 0x126   : > { %516 = vmin.xlane.f32.xlu0 %v1597_v43  ;;  %514 = vmin.xlane.f32.xlu1 %v1599_v44 }
 0x127   : > { %1214 = vmatpush3.msra.mxu1 %v672_v42 }
 0x12a   : > { %518 = vmin.xlane.f32.xlu1 %v1605_v46 }
 0x1a1   : > { %v1612_v50 = vpop.xlane.xlu1 %508 }
 0x1a2   : > { %vm524_vm2 = vcmp.le.f32.partialorder %v498_v30, %v1612_v50  ;;  %vm805_vm3 = vcmp.lt.f32.partialorder %v1612_v50, %v1608_v48 }
 0x1a3   : > { %v1619_v52 = vpop.xlane.xlu0 %504  ;;  %v813_v53 = vsel %vm805_vm3, %v1612_v50, %v1608_v48  ;;  %v1628_v54 = vsel %vm524_vm2, %v1610_v49, 128 }
 0x1a4   : > { %vm522_vm4 = vcmp.le.f32.partialorder %v496_v32, %v1619_v52  ;;  %vm803_vm5 = vcmp.lt.f32.partialorder %v1619_v52, %v1614_v51  ;;  %822 = vst.msk [vmem:[#allocation2 + $0x10] sm:$0xff] %vm334_vm1, %v813_v53  ;;  %v567_v62 = vshra.s32 %v1628_v54, 16  ;;  %v667_v53 = vld [vmem:[%s2016_s1 + $0x48] sm:$0xff] }
 0x1a5   : > { %v1635_v56 = vpop.xlane.xlu1 %510  ;;  %v1638_v57 = vsel %vm522_vm4, %v1610_v49, 128  ;;  %v811_v58 = vsel %vm803_vm5, %v1619_v52, %v1614_v51 }
 0x1a6   : > { %vm525_vm6 = vcmp.le.f32.partialorder %v499_v34, %v1635_v56  ;;  %v539_v59 = vshra.s32 %v1638_v57, 16  ;;  %820 = vst.msk [vmem:[#allocation2] sm:$0xff] %vm334_vm1, %v811_v58  ;;  %vm806_vm7 = vcmp.lt.f32.partialorder %v1635_v56, %v1633_v55  ;;  %v1683_v9 = vcvt.s32.f32 %v567_v62  ;;  %v666_v58 = vld [vmem:[%s2016_s1 + $0x40] sm:$0xff]  ;;  %v664_v62 = vld [vmem:[%s2016_s1 + $0x30] sm:$0xff] }
 0x1a7   : > { %v1650_v61 = vpop.xlane.xlu0 %506  ;;  %v1662_v1 = vsel %vm525_vm6, %v1610_v49, 128  ;;  %v814_v2 = vsel %vm806_vm7, %v1635_v56, %v1633_v55 }
 0x1a8   : > { %vm523_vm8 = vcmp.le.f32.partialorder %v497_v37, %v1650_v61  ;;  %v1656_v63 = vcvt.s32.f32 %v539_v59  ;;  %vm804_vm9 = vcmp.lt.f32.partialorder %v1650_v61, %v1647_v60  ;;  %823 = vst.msk [vmem:[#allocation2 + $0x18] sm:$0xff] %vm334_vm1, %v814_v2  ;;  %v581_v11 = vshra.s32 %v1662_v1, 16  ;;  %v665_v59 = vld [vmem:[%s2016_s1 + $0x38] sm:$0xff]  ;;  %v663_v2 = vld [vmem:[%s2016_s1 + $0x28] sm:$0xff] }
 0x1a9   : > { %v1659_v0 = vsel %vm523_vm8, %v1610_v49, 128  ;;  %v812_v7 = vsel %vm804_vm9, %v1650_v61, %v1647_v60  ;;  %v580_v41 = vand.u32 65535, %v1662_v1 }
 0x1aa   : > { %542 = vmin.xlane.f32.xlu0 %v1656_v63  ;;  %v553_v4 = vshra.s32 %v1659_v0, 16  ;;  %821 = vst.msk [vmem:[#allocation2 + $0x8] sm:$0xff] %vm334_vm1, %v812_v7  ;;  %v1718_v24 = vcvt.s32.f32 %v581_v11  ;;  %v538_v7 = vand.u32 65535, %v1638_v57 }
 0x1ab   : > { %v1681_v8 = vpop.xlane.xlu0 %512 }
 0x1ac   : > { %vm526_vm10 = vcmp.le.f32.partialorder %v500_v40, %v1681_v8  ;;  %v1687_v10 = vcvt.s32.f32 %v553_v4  ;;  %vm807_vm11 = vcmp.lt.f32.partialorder %v1681_v8, %v1671_v3  ;;  %v662_v4 = vld [vmem:[%s2016_s1 + $0x20] sm:$0xff] }
 0x1ad   : > { %v1693_v12 = vsel %vm526_vm10, %v1610_v49, 128  ;;  %v815_v13 = vsel %vm807_vm11, %v1681_v8, %v1671_v3  ;;  %v840_v60 = vsel %vm807_vm11, 1, %v1414_v45 }
 0x1ae   : > { %570 = vmin.xlane.f32.xlu0 %v1683_v9  ;;  %556 = vmin.xlane.f32.xlu1 %v1687_v10  ;;  %v595_v14 = vshra.s32 %v1693_v12, 16  ;;  %824 = vst.msk [vmem:[#allocation2 + $0x20] sm:$0xff] %vm334_vm1, %v815_v13  ;;  %v540_v13 = vcvt.s32.f32 %v538_v7  ;;  %v594_v57 = vand.u32 65535, %v1693_v12  ;;  %v838_v7 = vsel %vm805_vm3, 1, %v1414_v45 }
 0x1af   : > { %v1708_v17 = vpop.xlane.xlu0 %516  ;;  %v1710_v18 = vpop.xlane.xlu1 %514 }
 0x1b0   : > { %vm528_vm12 = vcmp.le.f32.partialorder %v1597_v43, %v1708_v17  ;;  %vm527_vm13 = vcmp.le.f32.partialorder %v1599_v44, %v1710_v18  ;;  %v1716_v23 = vcvt.s32.f32 %v595_v14  ;;  %vm808_vm14 = vcmp.lt.f32.partialorder %v1710_v18, %v1704_v15  ;;  %v671_v43 = vld [vmem:[%s2016_s1 + $0x68] sm:$0xff]  ;;  %v670_v44 = vld [vmem:[%s2016_s1 + $0x60] sm:$0xff] }
 0x1b1   : > { %v1721_v27 = vsel %vm528_vm12, %v1610_v49, 128  ;;  %v1724_v28 = vsel %vm527_vm13, %v1610_v49, 128  ;;  %vm809_vm15 = vcmp.lt.f32.partialorder %v1708_v17, %v1706_v16  ;;  %v816_v33 = vsel %vm808_vm14, %v1710_v18, %v1704_v15  ;;  %1215 = vmatprep.subr.mxu1 %v671_v43 }
 0x1b2   : > { %598 = vmin.xlane.f32.xlu0 %v1716_v23  ;;  %584 = vmin.xlane.f32.xlu1 %v1718_v24  ;;  %v623_v29 = vshra.s32 %v1721_v27, 16  ;;  %v609_v30 = vshra.s32 %v1724_v28, 16  ;;  %v817_v34 = vsel %vm809_vm15, %v1708_v17, %v1706_v16  ;;  %825 = vst.msk [vmem:[#allocation2 + $0x28] sm:$0xff] %vm334_vm1, %v816_v33  ;;  %v566_v14 = vand.u32 65535, %v1628_v54 }
 0x1b3   : > { %v1736_v32 = vpop.xlane.xlu1 %518  ;;  %826 = vst.msk [vmem:[#allocation2 + $0x30] sm:$0xff] %vm334_vm1, %v817_v34  ;;  %1216 = vmatpush3.msra.mxu1 %v671_v43  ;;  %v596_v43 = vcvt.s32.f32 %v594_v57  ;;  %v622_v12 = vand.u32 65535, %v1721_v27  ;;  %v608_v1 = vand.u32 65535, %v1724_v28  ;;  %v841_v51 = vsel %vm808_vm14, 1, %v1414_v45 }
 0x1b4   : > { %vm529_vm2 = vcmp.le.f32.partialorder %v1605_v46, %v1736_v32  ;;  %v1750_v35 = vcvt.s32.f32 %v623_v29  ;;  %v1752_v36 = vcvt.s32.f32 %v609_v30  ;;  %vm810_vm4 = vcmp.lt.f32.partialorder %v1736_v32, %v1734_v31  ;;  %v669_v46 = vld [vmem:[%s2016_s1 + $0x58] sm:$0xff]  ;;  %1217 = vmatprep.subr.mxu1 %v670_v44 }
 0x1b5   : > { %v1757_v37 = vsel %vm529_vm2, %v1610_v49, 128  ;;  %v818_v39 = vsel %vm810_vm4, %v1736_v32, %v1734_v31  ;;  %1218 = vmatpush3.msra.mxu1 %v670_v44  ;;  %v552_v29 = vand.u32 65535, %v1659_v0  ;;  %v582_v44 = vcvt.s32.f32 %v580_v41 }
 0x1b6   : > { %626 = vmin.xlane.f32.xlu0 %v1750_v35  ;;  %612 = vmin.xlane.f32.xlu1 %v1752_v36  ;;  %v637_v38 = vshra.s32 %v1757_v37, 16  ;;  %827 = vst.msk [vmem:[#allocation2 + $0x38] sm:$0xff] %vm334_vm1, %v818_v39  ;;  %v636_v27 = vand.u32 65535, %v1757_v37  ;;  %v842_v48 = vsel %vm809_vm15, 1, %v1414_v45  ;;  %v843_v50 = vsel %vm810_vm4, 1, %v1414_v45 }
 0x1b7   : > { %1219 = vmatprep.subr.mxu1 %v669_v46  ;;  %v554_v39 = vcvt.s32.f32 %v552_v29 }
 0x1b8   : > { %v1770_v40 = vcvt.s32.f32 %v637_v38  ;;  %1220 = vmatpush3.msra.mxu1 %v669_v46  ;;  %v568_v38 = vcvt.s32.f32 %v566_v14 }
 0x1b9   : > { %1221 = vmatprep.subr.mxu1 %v668_v47 }
 0x1ba   : > { %640 = vmin.xlane.f32.xlu1 %v1770_v40  ;;  %1222 = vmatpush3.msra.mxu1 %v668_v47 }
 0x1bb   : > { %1223 = vmatprep.subr.mxu1 %v667_v53 }
 0x1bc   : > { %1224 = vmatpush3.msra.mxu1 %v667_v53  ;;  %v624_v53 = vcvt.s32.f32 %v622_v12 }
 0x1bd   : > { %1225 = vmatprep.subr.mxu1 %v666_v58 }
 0x1be   : > { %1226 = vmatpush3.msra.mxu1 %v666_v58  ;;  %v610_v58 = vcvt.s32.f32 %v608_v1 }
 0x1bf   : > { %1227 = vmatprep.subr.mxu1 %v665_v59 }
 0x1c0   : > { %1228 = vmatpush3.msra.mxu1 %v665_v59  ;;  %v660_v59 = vld [vmem:[%s2016_s1 + $0x10] sm:$0xff] }
 0x1c1   : > { %1229 = vmatprep.subr.mxu1 %v664_v62 }
 0x1c2   : > { %1230 = vmatpush3.msra.mxu1 %v664_v62  ;;  %v638_v62 = vcvt.s32.f32 %v636_v27 }
 0x1c3   : > { %1231 = vmatprep.subr.mxu1 %v663_v2 }
 0x1c4   : > { %1232 = vmatpush3.msra.mxu1 %v663_v2  ;;  %v658_v2 = vld [vmem:[%s2016_s1] sm:$0xff] }
 0x1c5   : > { %1233 = vmatprep.subr.mxu1 %v662_v4 }
 0x1c6   : > { %1234 = vmatpush3.msra.mxu1 %v662_v4  ;;  %v836_v4 = vsel %vm803_vm5, 1, %v1414_v45 }
 0x233   : > { %v1810_v11 = vpop.xlane.xlu0 %542 }
 0x234   : > { %vm544_vm1 = vcmp.eq.f32.partialorder %v1656_v63, %v1810_v11  ;;  %v549_v52 = vcvt.f32.s32 %v1810_v11  ;;  %v1415_v11 = vmov 1.0  }
 0x235   : > { %v545_v30 = vsel %vm544_vm1, %v540_v13, inf  ;;  %v839_v13 = vsel %vm806_vm7, 1, %v1414_v45 }
 0x236   : > { %546 = vmin.xlane.f32.xlu0 %v545_v30  ;;  %v550_v61 = vshll.u32 %v549_v52, 16  ;;  %v830_v52 = vld [vmem:[#allocation3 + $0x10] sm:$0xff] }
 0x237   : > { %v1816_v33 = vpop.xlane.xlu0 %570  ;;  %v1818_v34 = vpop.xlane.xlu1 %556 }
 0x238   : > { %vm572_vm6 = vcmp.eq.f32.partialorder %v1683_v9, %v1816_v33  ;;  %vm558_vm8 = vcmp.eq.f32.partialorder %v1687_v10, %v1818_v34  ;;  %v577_v55 = vcvt.f32.s32 %v1816_v33  ;;  %v563_v3 = vcvt.f32.s32 %v1818_v34 }
 0x239   : > { %v573_v54 = vsel %vm572_vm6, %v568_v38, inf  ;;  %v559_v63 = vsel %vm558_vm8, %v554_v39, inf }
 0x23a   : > { %574 = vmin.xlane.f32.xlu0 %v573_v54  ;;  %560 = vmin.xlane.f32.xlu1 %v559_v63  ;;  %v578_v18 = vshll.u32 %v577_v55, 16  ;;  %v564_v31 = vshll.u32 %v563_v3, 16 }
 0x23b   : > { %v1826_v0 = vpop.xlane.xlu0 %598  ;;  %v1828_v42 = vpop.xlane.xlu1 %584 }
 0x23c   : > { %vm600_vm10 = vcmp.eq.f32.partialorder %v1716_v23, %v1826_v0  ;;  %vm586_vm12 = vcmp.eq.f32.partialorder %v1718_v24, %v1828_v42  ;;  %v661_v23 = vld [vmem:[%s2016_s1 + $0x18] sm:$0xff]  ;;  %v605_v16 = vcvt.f32.s32 %v1826_v0  ;;  %v591_v17 = vcvt.f32.s32 %v1828_v42 }
 0x23d   : > { %v601_v9 = vsel %vm600_vm10, %v596_v43, inf  ;;  %v587_v10 = vsel %vm586_vm12, %v582_v44, inf  ;;  %1235 = vmatprep.subr.mxu1 %v661_v23 }
 0x23e   : > { %602 = vmin.xlane.f32.xlu0 %v601_v9  ;;  %588 = vmin.xlane.f32.xlu1 %v587_v10  ;;  %v606_v38 = vshll.u32 %v605_v16, 16  ;;  %v592_v34 = vshll.u32 %v591_v17, 16 }
 0x23f   : > { %v1836_v46 = vpop.xlane.xlu0 %626  ;;  %v1838_v47 = vpop.xlane.xlu1 %612  ;;  %1236 = vmatpush3.msra.mxu1 %v661_v23 }
 0x240   : > { %vm628_vm13 = vcmp.eq.f32.partialorder %v1750_v35, %v1836_v46  ;;  %vm614_vm2 = vcmp.eq.f32.partialorder %v1752_v36, %v1838_v47  ;;  %1237 = vmatprep.subr.mxu1 %v660_v59  ;;  %v659_v36 = vld [vmem:[%s2016_s1 + $0x8] sm:$0xff]  ;;  %v633_v39 = vcvt.f32.s32 %v1836_v46  ;;  %v619_v57 = vcvt.f32.s32 %v1838_v47 }
 0x241   : > { %v629_v24 = vsel %vm628_vm13, %v624_v53, inf  ;;  %v615_v28 = vsel %vm614_vm2, %v610_v58, inf  ;;  %1238 = vmatpush3.msra.mxu1 %v660_v59 }
 0x242   : > { %630 = vmin.xlane.f32.xlu0 %v629_v24  ;;  %616 = vmin.xlane.f32.xlu1 %v615_v28  ;;  %v634_v44 = vshll.u32 %v633_v39, 16  ;;  %v620_v12 = vshll.u32 %v619_v57, 16 }
 0x243   : > { %v1851_v37 = vpop.xlane.xlu1 %640  ;;  %1239 = vmatprep.subr.mxu1 %v659_v36 }
 0x244   : > { %vm642_vm1 = vcmp.eq.f32.partialorder %v1770_v40, %v1851_v37  ;;  %1240 = vmatpush3.msra.mxu1 %v659_v36  ;;  %v837_v40 = vsel %vm804_vm9, 1, %v1414_v45  ;;  %v647_v1 = vcvt.f32.s32 %v1851_v37 }
 0x245   : > { %v643_v35 = vsel %vm642_vm1, %v638_v62, inf  ;;  %1241 = vmatprep.subr.mxu1 %v658_v2 }
 0x246   : > { %644 = vmin.xlane.f32.xlu1 %v643_v35  ;;  %1242 = vmatpush3.msra.mxu1 %v658_v2  ;;  %v648_v23 = vshll.u32 %v647_v1, 16  ;;  %v829_v2 = vld [vmem:[#allocation3 + $0x8] sm:$0xff] }
 0x257   : > { %848 = vperm.xlu1 %1326, %v837_v40  }
 0x258   : > { %845 = vperm.xlu0 %1325, %v836_v4  }
 0x25b   : > { %851 = vperm.xlu1 %1326, %v838_v7   ;;  %v828_v7 = vld [vmem:[#allocation3] sm:$0xff] }
 0x25f   : > { %854 = vperm.xlu1 %1326, %v839_v13  }
 0x263   : > { %857 = vperm.xlu1 %1326, %v840_v60  }
 0x267   : > { %860 = vperm.xlu1 %1326, %v841_v51   ;;  %v831_v51 = vld [vmem:[#allocation3 + $0x18] sm:$0xff] }
 0x26b   : > { %863 = vperm.xlu1 %1326, %v842_v48  }
 0x26f   : > { %866 = vperm.xlu1 %1326, %v843_v50  }
 0x2bf   : > { %v547_v56 = vpop.xlane.xlu0 %546 }
 0x2c0   : > { %v548_v8 = vcvt.f32.s32 %v547_v56 }
 0x2c2   : > { %v551_v15 = vadd.s32 %v550_v61, %v548_v8  ;;  %v833_v61 = vld [vmem:[#allocation3 + $0x28] sm:$0xff] }
 0x2c3   : > { %v575_v14 = vpop.xlane.xlu0 %574  ;;  %v561_v29 = vpop.xlane.xlu1 %560 }
 0x2c4   : > { %v576_v45 = vcvt.f32.s32 %v575_v14  ;;  %v562_v32 = vcvt.f32.s32 %v561_v29  ;;  %vm650_vm3 = vcmp.eq.s32.totalorder %v1610_v49, %v551_v15  ;;  %v832_v15 = vld [vmem:[#allocation3 + $0x20] sm:$0xff]  ;;  %v835_v29 = vld [vmem:[#allocation3 + $0x38] sm:$0xff] }
 0x2c5   : > { %1243 = vmatprep.mubr.msk.f32.mxu1 %vm650_vm3, %v1415_v11 }
 0x2c6   : > { %v579_v30 = vadd.s32 %v578_v18, %v576_v45  ;;  %v565_v33 = vadd.s32 %v564_v31, %v562_v32 }
 0x2c7   : > { %v603_v41 = vpop.xlane.xlu0 %602  ;;  %v589_v54 = vpop.xlane.xlu1 %588 }
 0x2c8   : > { %v604_v63 = vcvt.f32.s32 %v603_v41  ;;  %v590_v0 = vcvt.f32.s32 %v589_v54  ;;  %vm651_vm5 = vcmp.eq.s32.totalorder %v1610_v49, %v565_v33  ;;  %vm652_vm7 = vcmp.eq.s32.totalorder %v1610_v49, %v579_v30  ;;  %v834_v30 = vld [vmem:[#allocation3 + $0x30] sm:$0xff] }
 0x2c9   : > { %1244 = vmatmul.mubr.msk.f32.vlgmr.msra.gmra.mxu1 %vm651_vm5, %v1415_v11 }
 0x2ca   : > { %v607_v42 = vadd.s32 %v606_v38, %v604_v63  ;;  %v593_v43 = vadd.s32 %v592_v34, %v590_v0  ;;  %1246 = vmatprep.mubr.msk.f32.mxu1 %vm652_vm7, %v1415_v11 }
 0x2cb   : > { %v631_v9 = vpop.xlane.xlu0 %630  ;;  %v617_v10 = vpop.xlane.xlu1 %616 }
 0x2cc   : > { %v632_v46 = vcvt.f32.s32 %v631_v9  ;;  %v618_v47 = vcvt.f32.s32 %v617_v10  ;;  %vm653_vm9 = vcmp.eq.s32.totalorder %v1610_v49, %v593_v43  ;;  %vm654_vm11 = vcmp.eq.s32.totalorder %v1610_v49, %v607_v42 }
 0x2cd   : > { %1247 = vmatmul.mubr.msk.f32.gmra.mxu1 %vm653_vm9, %v1415_v11 }
 0x2ce   : > { %v635_v53 = vadd.s32 %v634_v44, %v632_v46  ;;  %v621_v58 = vadd.s32 %v620_v12, %v618_v47  ;;  %1249 = vmatprep.mubr.msk.f32.mxu1 %vm654_vm11, %v1415_v11 }
 0x2cf   : > { %v645_v27 = vpop.xlane.xlu1 %644 }
 0x2d0   : > { %v646_v24 = vcvt.f32.s32 %v645_v27  ;;  %vm655_vm14 = vcmp.eq.s32.totalorder %v1610_v49, %v621_v58  ;;  %vm656_vm15 = vcmp.eq.s32.totalorder %v1610_v49, %v635_v53 }
 0x2d1   : > { %1250 = vmatmul.mubr.msk.f32.gmra.mxu1 %vm655_vm14, %v1415_v11 }
 0x2d2   : > { %v649_v28 = vadd.s32 %v648_v23, %v646_v24  ;;  %1252 = vmatprep.mubr.msk.f32.mxu1 %vm656_vm15, %v1415_v11 }
 0x2d3   : > { %v849_v59 = vpop.permute.xlu1 %848  ;;  %v846_v40 = vpop.permute.xlu0 %845 }
 0x2d4   : > { %vm657_vm4 = vcmp.eq.s32.totalorder %v1610_v49, %v649_v28  ;;  %vm869_vm6 = vcmp.eq.s32.totalorder %v849_v59, 1  ;;  %vm868_vm8 = vcmp.eq.s32.totalorder %v846_v40, 1 }
 0x2d5   : > { %1253 = vmatmul.mubr.msk.f32.gmra.mxu1 %vm657_vm4, %v1415_v11 }
 0x2d7   : > { %v852_v37 = vpop.permute.xlu1 %851 }
 0x2d8   : > { %vm870_vm12 = vcmp.eq.s32.totalorder %v852_v37, 1 }
 0x2db   : > { %v855_v62 = vpop.permute.xlu1 %854 }
 0x2dc   : > { %vm871_vm10 = vcmp.eq.s32.totalorder %v855_v62, 1 }
 0x2df   : > { %v858_v35 = vpop.permute.xlu1 %857 }
 0x2e0   : > { %vm872_vm2 = vcmp.eq.s32.totalorder %v858_v35, 1 }
 0x2e3   : > { %v861_v36 = vpop.permute.xlu1 %860 }
 0x2e4   : > { %vm873_vm13 = vcmp.eq.s32.totalorder %v861_v36, 1 }
 0x2e7   : > { %v864_v49 = vpop.permute.xlu1 %863 }
 0x2e8   : > { %vm874_vm3 = vcmp.eq.s32.totalorder %v864_v49, 1 }
 0x2eb   : > { %v867_v18 = vpop.permute.xlu1 %866 }
 0x2ec   : > { %vm875_vm1 = vcmp.eq.s32.totalorder %v867_v18, 1 }
 0x389   : > { %v1245_v4 = vpop.f32.mrf.mxu1 }
 0x38a   : > { %v877_v13 = vsel %vm869_vm6, %v1245_v4, %v829_v2 }
 0x38b   : > { %885 = vst.msk [vmem:[#allocation3 + $0x8] sm:$0xff] %vm387_vm0, %v877_v13  ;;  %v756_v60 = vpop.f32.mrf.mxu1 }
 0x38c   : > { %v876_v48 = vsel %vm868_vm8, %v756_v60, %v828_v7 }
 0x38d   : > { %884 = vst.msk [vmem:[#allocation3] sm:$0xff] %vm387_vm0, %v876_v48  ;;  %v1248_v50 = vpop.f32.mrf.mxu1 }
 0x38e   : > { %v879_v55 = vsel %vm871_vm10, %v1248_v50, %v831_v51 }
 0x38f   : > { %887 = vst.msk [vmem:[#allocation3 + $0x18] sm:$0xff] %vm387_vm0, %v879_v55  ;;  %v766_v56 = vpop.f32.mrf.mxu1 }
 0x390   : > { %v878_v3 = vsel %vm870_vm12, %v766_v56, %v830_v52 }
 0x391   : > { %886 = vst.msk [vmem:[#allocation3 + $0x10] sm:$0xff] %vm387_vm0, %v878_v3  ;;  %v1251_v8 = vpop.f32.mrf.mxu1 }
 0x392   : > { %v881_v16 = vsel %vm873_vm13, %v1251_v8, %v833_v61  ;;  %v896_v17 = vld [vmem:[#allocation3 + $0x8] sm:$0xff] }
 0x393   : > { %889 = vst.msk [vmem:[#allocation3 + $0x28] sm:$0xff] %vm387_vm0, %v881_v16  ;;  %v776_v14 = vpop.f32.mrf.mxu1  ;;  %v912_v31 = vsub.f32 %v1528_v6, %v896_v17  ;;  %904 = vst.msk [vmem:[%s1918_s25 + $0x8] sm:$0xff] %vm387_vm0, %v896_v17 }
 0x394   : > { %v880_v45 = vsel %vm872_vm2, %v776_v14, %v832_v15  ;;  %v895_v32 = vld [vmem:[#allocation3] sm:$0xff] }
 0x395   : > { %888 = vst.msk [vmem:[#allocation3 + $0x20] sm:$0xff] %vm387_vm0, %v880_v45  ;;  %v1254_v11 = vpop.f32.mrf.mxu1  ;;  %v911_v33 = vsub.f32 %v1525_v5, %v895_v32  ;;  %903 = vst.msk [vmem:[%s1918_s25] sm:$0xff] %vm387_vm0, %v895_v32  ;;  %v920_v41 = vmul.f32 %v912_v31, %v912_v31 }
 0x396   : > { %v883_v6 = vsel %vm875_vm1, %v1254_v11, %v835_v29  ;;  %v898_v38 = vld [vmem:[#allocation3 + $0x18] sm:$0xff] }
 0x397   : > { %891 = vst.msk [vmem:[#allocation3 + $0x38] sm:$0xff] %vm387_vm0, %v883_v6  ;;  %v786_v34 = vpop.f32.mrf.mxu1  ;;  %v914_v39 = vsub.f32 %v1563_v20, %v898_v38  ;;  %v919_v57 = vmul.f32 %v911_v33, %v911_v33  ;;  %906 = vst.msk [vmem:[%s1918_s25 + $0x18] sm:$0xff] %vm387_vm0, %v898_v38  ;;  %v928_v12 = vsel %vm387_vm0, %v920_v41, 0.0 }
 0x398   : > { %v882_v54 = vsel %vm874_vm3, %v786_v34, %v834_v30  ;;  %v897_v63 = vld [vmem:[#allocation3 + $0x10] sm:$0xff] }
 0x399   : > { %890 = vst.msk [vmem:[#allocation3 + $0x30] sm:$0xff] %vm387_vm0, %v882_v54  ;;  %v913_v5 = vsub.f32 %v1560_v19, %v897_v63  ;;  %v927_v0 = vsel %vm387_vm0, %v919_v57, 0.0  ;;  %905 = vst.msk [vmem:[%s1918_s25 + $0x10] sm:$0xff] %vm387_vm0, %v897_v63  ;;  %v922_v44 = vmul.f32 %v914_v39, %v914_v39 }
 0x39a   : > { %v900_v42 = vld [vmem:[#allocation3 + $0x28] sm:$0xff]  ;;  %v929_v9 = vadd.f32 %v928_v12, %v927_v0 }
 0x39b   : > { %v916_v43 = vsub.f32 %v1569_v22, %v900_v42  ;;  %v921_v20 = vmul.f32 %v913_v5, %v913_v5  ;;  %908 = vst.msk [vmem:[%s1918_s25 + $0x28] sm:$0xff] %vm387_vm0, %v900_v42  ;;  %v932_v27 = vsel %vm387_vm0, %v922_v44, 0.0 }
 0x39c   : > { %v899_v1 = vld [vmem:[#allocation3 + $0x20] sm:$0xff] }
 0x39d   : > { %v915_v10 = vsub.f32 %v1566_v21, %v899_v1  ;;  %v930_v19 = vsel %vm387_vm0, %v921_v20, 0.0  ;;  %907 = vst.msk [vmem:[%s1918_s25 + $0x20] sm:$0xff] %vm387_vm0, %v899_v1  ;;  %v924_v58 = vmul.f32 %v916_v43, %v916_v43 }
 0x39e   : > { %v902_v46 = vld [vmem:[#allocation3 + $0x38] sm:$0xff]  ;;  %v931_v47 = vadd.f32 %v930_v19, %v929_v9 }
 0x39f   : > { %v918_v22 = vsub.f32 %v1581_v26, %v902_v46  ;;  %v923_v53 = vmul.f32 %v915_v10, %v915_v10  ;;  %910 = vst.msk [vmem:[%s1918_s25 + $0x38] sm:$0xff] %vm387_vm0, %v902_v46  ;;  %v936_v62 = vsel %vm387_vm0, %v924_v58, 0.0 }
 0x3a0   : > { %v901_v23 = vld [vmem:[#allocation3 + $0x30] sm:$0xff]  ;;  %v933_v24 = vadd.f32 %v932_v27, %v931_v47 }
 0x3a1   : > { %v917_v21 = vsub.f32 %v1578_v25, %v901_v23  ;;  %v934_v28 = vsel %vm387_vm0, %v923_v53, 0.0  ;;  %909 = vst.msk [vmem:[%s1918_s25 + $0x30] sm:$0xff] %vm387_vm0, %v901_v23  ;;  %v926_v26 = vmul.f32 %v918_v22, %v918_v22 }
 0x3a2   : > { %v935_v59 = vadd.f32 %v934_v28, %v933_v24 }
 0x3a3   : > { %v925_v37 = vmul.f32 %v917_v21, %v917_v21  ;;  %v940_v40 = vsel %vm387_vm0, %v926_v26, 0.0 }
 0x3a4   : > { %v937_v35 = vadd.f32 %v936_v62, %v935_v59 }
 0x3a5   : > { %v938_v36 = vsel %vm387_vm0, %v925_v37, 0.0 }
 0x3a6   : > { %v939_v2 = vadd.f32 %v938_v36, %v937_v35 }
 0x3a8   : > { %v941_v4 = vadd.f32 %v940_v40, %v939_v2 }
 0x3aa   : > { %942 = vadd.xlane.f32.xlu1 %v941_v4 }
 0x3ab   : > { %1348 = shalt.err (!%p1345_p5)
}
 0x3ac   : > { %s1349_s15 = scalar_lea.hbm %s1959_s9, 1024  ;;  %s1353_s24 = scalar_lea.hbm %s2019_s4, 2048 }
 0x3ad   : > { %p1350_p6 = scmp.ne.s32.totalorder %s1959_s9, %s1349_s15  ;;  %p1354_p10 = scmp.lt.s32.totalorder %s1959_s9, %s2019_s4 }
 0x3ae   : > { %p1355_p11 = scmp.lt.s32.totalorder %s1353_s24, %s1349_s15 }
 0x3af   : > { %p1351_p7 = pnand %p1350_p6, %p1489_p4 }
 0x3b0   : > { %p1356_p12 = por %p1355_p11, %p1354_p10 }
 0x3b1   : > { %p1352_p9 = pneg %p1351_p7 }
 0x3b3   : > { %p1357_p13 = pnand %p1356_p12, %p1352_p9 }
 0x3b5   : > { %1360 = shalt.err (!%p1357_p13)
}
 0x3b6   : > { %s1417_s7 = smov 128   ;;  %s1418_s8 = smov 8   ;;  %vm952_vm0 = vcmask 0  }
 0x3b7   : > { %1265 = dma.vmem_to_hbm [thread:$0]  (%p1489_p4), %s1961_s29, 1024, %s1959_s9, %s1965_s10, %s1417_s7, %s1417_s7, %s1418_s8  }
 0x3b8   : > { %p302_p0 = scmp.lt.s32.totalorder %s1403_s21, 1 }
 0x3ba   : > { %s2033_s21 = smov (!%p302_p0, %s1403_s21), 1 }
 0x3bb   : > { %s304_s13 = scalar_lea.vmem %s2020_s5, %s2033_s21 }
 0x433   : > { %v943_v25 = vpop.xlane.xlu1 %942 }
 0x434   : > { %v944_v7 = vrot.slane %v943_v25, 4 }
 0x436   : > { %v945_v13 = vadd.f32 %v944_v7, %v943_v25 }
 0x438   : > { %v946_v60 = vrot.slane %v945_v13, 2 }
 0x43a   : > { %v947_v51 = vadd.f32 %v946_v60, %v945_v13 }
 0x43c   : > { %v948_v49 = vrot.slane %v947_v51, 1 }
 0x43e   : > { %v949_v48 = vadd.f32 %v948_v49, %v947_v51 }
 0x440   : > { %1263 = vpush %v949_v48 }
 0x471   : > { %s1264_s14 = spop %1263 }
 0x472   : > { %v951_v50 = vstv %s1264_s14 }
 0x473   : > { %953 = vst.msk [vmem:[%s304_s13] sm:$0x1] %vm952_vm0, %v951_v50 }
 0x474 PF: > { %p1271_p4 = scmp.ge.s32.totalorder %s1411_s23, 2  ;;  %s989_s28 = sand.u32 1, %s1391_s18  }
 0x475   : > { %s990_s29 = scalar_lea.sflag [#allocation5], %s989_s28 }
 0x476   : > { %p1268_p1 = pnand %p1271_p4, %p1496_p8 }
 0x478   : > { %p1269_p2 = pneg %p1268_p1 }
 0x47a   : > { %1386 = dma.done.wait (%p1269_p2), %s990_s29, 1024  }
 0x47b   : > { %1388 = vsyncadd (%p1269_p2), %s990_s29, 4294966272  ;;  %s19_s23 = sadd.s32 1, %s1411_s23   ;;  %s2023_s18 = smov %s1395_s19 }
 0x47c   : > { %p16_p3 = scmp.ge.s32.totalorder %s19_s23, 4   ;;  %s2024_s19 = smov %s1399_s20 }
 0x47d   : > { %s2025_s20 = smov %s1502_s6  ;;  %s2026_s21 = smov %s1407_s22 }
 0x47e   : > { %s2027_s22 = smov %s2029_s26  ;;  %18 = sbr.rel (!%p16_p3) target bundleno = 4 (0x4), region = 100 }
 0x483   :  { %1001 = vsyncpa [#allocation5], 1 }
 0x484   :  { %1003 = vsyncpa [#allocation5 + $0x1], 1 }

</bundles_post_ra>
